<compile_context>
chip_gen: v7x
topology: tpu7x:2x2x1
jax: 0.10.0
libtpu: 0.0.40
codegen_flags: <defaults>
</compile_context>

<pallas_src>
import functools

import jax
import jax.numpy as jnp
from jax.experimental import pallas as pl
from jax.experimental.pallas import tpu as pltpu


def _round_up(x, m):
    return ((x + m - 1) // m) * m


def _conv_bn_relu_kernel(x_ref, w_ref, scale_ref, shift_ref, o_ref, patch_ref,
                         *, kh, kw, cin, wp, stride, tm):
    # x_ref:     (1, L, Cin)           whole padded image, spatially flattened row-major
    # w_ref:     (KH*KW*Cin, Cout_p)   im2col weight matrix (lane-dense Cout_p)
    # scale_ref: (1, Cout_p) f32       folded BN scale = gamma * rsqrt(var+eps)
    # shift_ref: (1, Cout_p) f32       folded conv-bias + BN shift
    # o_ref:     (1, TM, Cout_p)       one output row-tile (TM = TR * Wp flat rows)
    # patch_ref: (TM, KH*KW*Cin)       im2col patch built in VMEM (written once, read once)
    base = pl.program_id(1) * (tm * stride)

    # Build the (TM, KH*KW*Cin) patch: each tap is a contiguous sublane slice of
    # the flattened image (single HBM read of the image; im2col happens in VMEM).
    for t in range(kh * kw):
        i, j = divmod(t, kw)
        start = base + i * wp + j
        if stride == 1:
            slab = x_ref[0, pl.ds(start, tm), :]
        else:
            # TODO(synk): stride > 1 (strided sublane read) is implemented but untested.
            slab = x_ref[0, pl.ds(start, tm, stride=stride), :]
        patch_ref[:, t * cin:(t + 1) * cin] = slab

    # Single MXU matmul with contraction dim KH*KW*Cin (f32 accumulation).
    y = jnp.dot(patch_ref[...], w_ref[...], preferred_element_type=jnp.float32)

    # Epilogue: folded bias + BatchNorm(eval) + ReLU, lane-dense store straight to o_ref.
    y = y * scale_ref[...] + shift_ref[...]
    o_ref[0] = jnp.maximum(y, 0.0).astype(o_ref.dtype)


@functools.partial(jax.jit, static_argnames=("kernel_size", "stride",
                                              "same_padding", "compute_dtype"))
def conv2d_bn_relu(x_nchw, weight, bias, bn_gamma, bn_beta, bn_mean, bn_var, *,
                   kernel_size, stride=1, same_padding=True, eps=1e-5,
                   compute_dtype=jnp.float32):
    """Forward pass of the PyTorch Conv2d module (conv + BN(eval) + ReLU)."""
    n, cin, h, w = x_nchw.shape
    cout = weight.shape[0]
    kh = kw = kernel_size
    pad = (kernel_size - 1) // 2 if same_padding else 0

    hp, wp = h + 2 * pad, w + 2 * pad
    oh = (hp - kh) // stride + 1
    ow = (wp - kw) // stride + 1

    # Lane-dense output channels; 256-aligned when the layer can fill v6e/v7x's
    # 256-wide MXU, otherwise 128 (full width on v5e, minimal padding here).
    lane_tile = 256 if cout > 128 else 128
    cout_p = _round_up(cout, lane_tile)

    k_dim = kh * kw * cin                 # im2col contraction depth
    m_total = oh * wp                     # flat output rows incl. garbage cols x in [ow, wp)
    l_rows = _round_up(stride * (m_total - 1) + (kh - 1) * wp + (kw - 1) + 1, 8)

    # Row-tile: largest TR <= 8 dividing OH with TM = TR*Wp a multiple of 8;
    # fall back to the full image (block == full dim is always legal).
    tr = oh
    for cand in range(min(oh, 8), 0, -1):
        if oh % cand == 0 and (cand * wp) % 8 == 0:
            tr = cand
            break
    num_row_tiles = oh // tr
    tm = tr * wp

    # ---- glue (plain JAX): layout, spatial pad, weight/BN folding ----
    # TODO(synk): in a chained MobileNet these per-layer transposes/pads/slices
    # should be removed by keeping a padded flattened-NHWC activation format.
    x_nhwc = jnp.transpose(x_nchw, (0, 2, 3, 1))
    x_pad = jnp.pad(x_nhwc, ((0, 0), (pad, pad), (pad, pad), (0, 0)))
    x_flat = x_pad.reshape(n, hp * wp, cin)
    x_flat = jnp.pad(x_flat, ((0, 0), (0, l_rows - hp * wp), (0, 0)))
    x_flat = x_flat.astype(compute_dtype)

    # (Cout, Cin, KH, KW) -> (KH, KW, Cin, Cout) -> (KH*KW*Cin, Cout_p)
    w_flat = jnp.transpose(weight, (2, 3, 1, 0)).reshape(k_dim, cout)
    w_flat = jnp.pad(w_flat, ((0, 0), (0, cout_p - cout))).astype(compute_dtype)

    # Fold conv bias + eval-mode BatchNorm into per-channel scale/shift:
    #   y = ((conv + bias) - mean) * gamma / sqrt(var+eps) + beta
    inv_std = jax.lax.rsqrt(bn_var + eps)
    scale = bn_gamma * inv_std
    shift = bn_beta + (bias - bn_mean) * scale
    scale = jnp.pad(scale, (0, cout_p - cout)).reshape(1, cout_p).astype(jnp.float32)
    shift = jnp.pad(shift, (0, cout_p - cout)).reshape(1, cout_p).astype(jnp.float32)

    kern = functools.partial(_conv_bn_relu_kernel, kh=kh, kw=kw, cin=cin,
                             wp=wp, stride=stride, tm=tm)

    itemsize = jnp.dtype(compute_dtype).itemsize
    flops = 2 * n * m_total * k_dim * cout_p
    bytes_accessed = (x_flat.size * itemsize + w_flat.size * itemsize
                      + 2 * cout_p * 4 + n * m_total * cout_p * 4)

    out_p = pl.pallas_call(
        kern,
        out_shape=jax.ShapeDtypeStruct((n, m_total, cout_p), jnp.float32),
        grid_spec=pltpu.PrefetchScalarGridSpec(
            num_scalar_prefetch=0,
            grid=(n, num_row_tiles),
            in_specs=[
                # whole flattened image; same block for every row tile -> no re-DMA
                pl.BlockSpec((1, l_rows, cin), lambda b, r: (b, 0, 0)),
                # grid-invariant weight / scale / shift
                pl.BlockSpec((k_dim, cout_p), lambda b, r: (0, 0)),
                pl.BlockSpec((1, cout_p), lambda b, r: (0, 0)),
                pl.BlockSpec((1, cout_p), lambda b, r: (0, 0)),
            ],
            out_specs=pl.BlockSpec((1, tm, cout_p), lambda b, r: (b, r, 0)),
            scratch_shapes=[pltpu.VMEM((tm, k_dim), compute_dtype)],
        ),
        compiler_params=pltpu.CompilerParams(
            dimension_semantics=("parallel", "parallel"),
            vmem_limit_bytes=48 * 1024 * 1024,   # legal on v7x (64 MiB) and v5e/v6e
        ),
        cost_estimate=pl.CostEstimate(
            flops=flops, transcendentals=0, bytes_accessed=int(bytes_accessed)),
    )(x_flat, w_flat, scale, shift)

    # Drop garbage columns (x in [ow, wp)) and Cout padding; NHWC -> NCHW.
    out = out_p.reshape(n, oh, wp, cout_p)[:, :, :ow, :cout]
    return jnp.transpose(out, (0, 3, 1, 2))


if __name__ == "__main__":
    key = jax.random.PRNGKey(0)
    k_x, k_w, k_b, k_g, k_be, k_m, k_v = jax.random.split(key, 7)

    # module config: Conv2d(in=4, out=8, kernel_size=3, stride=1, NL='relu',
    #                       same_padding=True, bn=True, bias=True)
    # TODO(synk): NL='prelu' and training-mode BatchNorm are not implemented.
    N, CIN, H, W = 2, 4, 16, 16
    COUT, KS, STRIDE = 8, 3, 1

    x = jax.random.normal(k_x, (N, CIN, H, W), dtype=jnp.float32)
    weight = jax.random.normal(k_w, (COUT, CIN, KS, KS), dtype=jnp.float32) * 0.1
    bias = jax.random.normal(k_b, (COUT,), dtype=jnp.float32) * 0.1
    bn_gamma = 1.0 + 0.1 * jax.random.normal(k_g, (COUT,), dtype=jnp.float32)
    bn_beta = 0.1 * jax.random.normal(k_be, (COUT,), dtype=jnp.float32)
    bn_mean = 0.1 * jax.random.normal(k_m, (COUT,), dtype=jnp.float32)
    bn_var = jax.random.uniform(k_v, (COUT,), dtype=jnp.float32,
                                minval=0.5, maxval=1.5)

    # f32 path (matches the PyTorch module bit-for-bit semantics within fp error)
    out = conv2d_bn_relu(x, weight, bias, bn_gamma, bn_beta, bn_mean, bn_var,
                         kernel_size=KS, stride=STRIDE, same_padding=True)
    out = jax.block_until_ready(out)

    # reference check with XLA conv (eval-mode BN + ReLU)
    ref = jax.lax.conv_general_dilated(
        x, weight, window_strides=(STRIDE, STRIDE),
        padding=[((KS - 1) // 2,) * 2] * 2,
        dimension_numbers=("NCHW", "OIHW", "NCHW"))
    ref = ref + bias[None, :, None, None]
    ref = (ref - bn_mean[None, :, None, None]) * jax.lax.rsqrt(
        bn_var + 1e-5)[None, :, None, None] * bn_gamma[None, :, None, None] \
        + bn_beta[None, :, None, None]
    ref = jnp.maximum(ref, 0.0)

    assert out.shape == (N, COUT, H, W), out.shape
    assert jnp.allclose(out, ref, atol=1e-4, rtol=1e-4), \
        float(jnp.max(jnp.abs(out - ref)))

    # bf16 MXU path (review item for v6e/v7x): bf16 inputs, f32 accumulation.
    out_bf16 = conv2d_bn_relu(x, weight, bias, bn_gamma, bn_beta, bn_mean, bn_var,
                              kernel_size=KS, stride=STRIDE, same_padding=True,
                              compute_dtype=jnp.bfloat16)
    out_bf16 = jax.block_until_ready(out_bf16)
    assert out_bf16.shape == (N, COUT, H, W), out_bf16.shape
    assert jnp.allclose(out_bf16, ref, atol=5e-2, rtol=5e-2), \
        float(jnp.max(jnp.abs(out_bf16 - ref)))

    print("KERNEL_OK")
</pallas_src>

<mosaic_0001>
module attributes {stable_mosaic.version = 11 : i64} {
  func.func @_conv_bn_relu_kernel(%arg0: i32, %arg1: i32, %arg2: memref<1x328x4xf32, #tpu.memory_space<vmem>>, %arg3: memref<36x128xf32, #tpu.memory_space<vmem>>, %arg4: memref<1x128xf32, #tpu.memory_space<vmem>>, %arg5: memref<1x128xf32, #tpu.memory_space<vmem>>, %arg6: memref<1x144x128xf32, #tpu.memory_space<vmem>>, %arg7: memref<144x36xf32, #tpu.memory_space<vmem>>) attributes {dimension_semantics = [#tpu.dimension_semantics<parallel>, #tpu.dimension_semantics<parallel>], iteration_bounds = array<i64: 2, 2>, scalar_prefetch = 0 : i64, scratch_operands = 1 : i64, tpu.core_type = #tpu.core_type<tc>, window_params = [{transform_indices = @transform_0, window_bounds = array<i64: 1, 328, 4>}, {pipeline_mode = #tpu.pipeline_mode<synchronous>, transform_indices = @transform_1, window_bounds = array<i64: 36, 128>}, {pipeline_mode = #tpu.pipeline_mode<synchronous>, transform_indices = @transform_2, window_bounds = array<i64: 1, 128>}, {pipeline_mode = #tpu.pipeline_mode<synchronous>, transform_indices = @transform_3, window_bounds = array<i64: 1, 128>}, {transform_indices = @transform_4, window_bounds = array<i64: 1, 144, 128>}]} {
    %c144_i32 = arith.constant 144 : i32
    %0 = arith.muli %arg1, %c144_i32 : i32
    %c0_i32 = arith.constant 0 : i32
    %1 = arith.addi %0, %c0_i32 : i32
    %c0_i32_0 = arith.constant 0 : i32
    %2 = arith.addi %1, %c0_i32_0 : i32
    %c0 = arith.constant 0 : index
    %3 = arith.index_cast %2 : i32 to index
    %c0_1 = arith.constant 0 : index
    %4 = vector.load %arg2[%c0, %3, %c0_1] : memref<1x328x4xf32, #tpu.memory_space<vmem>>, vector<1x144x4xf32>
    %5 = vector.shape_cast %4 : vector<1x144x4xf32> to vector<144x4xf32>
    %c0_2 = arith.constant 0 : index
    %c0_3 = arith.constant 0 : index
    %6 = vector.load %arg7[%c0_2, %c0_3] : memref<144x36xf32, #tpu.memory_space<vmem>>, vector<144x4xf32>
    tpu.vector_store %arg7[%c0_2, %c0_3], %5 {strides = array<i32>} : memref<144x36xf32, #tpu.memory_space<vmem>>, vector<144x4xf32>,
    %c0_i32_4 = arith.constant 0 : i32
    %7 = arith.addi %0, %c0_i32_4 : i32
    %c1_i32 = arith.constant 1 : i32
    %8 = arith.addi %7, %c1_i32 : i32
    %c0_5 = arith.constant 0 : index
    %9 = arith.index_cast %8 : i32 to index
    %c0_6 = arith.constant 0 : index
    %10 = vector.load %arg2[%c0_5, %9, %c0_6] : memref<1x328x4xf32, #tpu.memory_space<vmem>>, vector<1x144x4xf32>
    %11 = vector.shape_cast %10 : vector<1x144x4xf32> to vector<144x4xf32>
    %c0_7 = arith.constant 0 : index
    %c4 = arith.constant 4 : index
    %12 = vector.load %arg7[%c0_7, %c4] : memref<144x36xf32, #tpu.memory_space<vmem>>, vector<144x4xf32>
    tpu.vector_store %arg7[%c0_7, %c4], %11 {strides = array<i32>} : memref<144x36xf32, #tpu.memory_space<vmem>>, vector<144x4xf32>,
    %c0_i32_8 = arith.constant 0 : i32
    %13 = arith.addi %0, %c0_i32_8 : i32
    %c2_i32 = arith.constant 2 : i32
    %14 = arith.addi %13, %c2_i32 : i32
    %c0_9 = arith.constant 0 : index
    %15 = arith.index_cast %14 : i32 to index
    %c0_10 = arith.constant 0 : index
    %16 = vector.load %arg2[%c0_9, %15, %c0_10] : memref<1x328x4xf32, #tpu.memory_space<vmem>>, vector<1x144x4xf32>
    %17 = vector.shape_cast %16 : vector<1x144x4xf32> to vector<144x4xf32>
    %c0_11 = arith.constant 0 : index
    %c8 = arith.constant 8 : index
    %18 = vector.load %arg7[%c0_11, %c8] : memref<144x36xf32, #tpu.memory_space<vmem>>, vector<144x4xf32>
    tpu.vector_store %arg7[%c0_11, %c8], %17 {strides = array<i32>} : memref<144x36xf32, #tpu.memory_space<vmem>>, vector<144x4xf32>,
    %c18_i32 = arith.constant 18 : i32
    %19 = arith.addi %0, %c18_i32 : i32
    %c0_i32_12 = arith.constant 0 : i32
    %20 = arith.addi %19, %c0_i32_12 : i32
    %c0_13 = arith.constant 0 : index
    %21 = arith.index_cast %20 : i32 to index
    %c0_14 = arith.constant 0 : index
    %22 = vector.load %arg2[%c0_13, %21, %c0_14] : memref<1x328x4xf32, #tpu.memory_space<vmem>>, vector<1x144x4xf32>
    %23 = vector.shape_cast %22 : vector<1x144x4xf32> to vector<144x4xf32>
    %c0_15 = arith.constant 0 : index
    %c12 = arith.constant 12 : index
    %24 = vector.load %arg7[%c0_15, %c12] : memref<144x36xf32, #tpu.memory_space<vmem>>, vector<144x4xf32>
    tpu.vector_store %arg7[%c0_15, %c12], %23 {strides = array<i32>} : memref<144x36xf32, #tpu.memory_space<vmem>>, vector<144x4xf32>,
    %c18_i32_16 = arith.constant 18 : i32
    %25 = arith.addi %0, %c18_i32_16 : i32
    %c1_i32_17 = arith.constant 1 : i32
    %26 = arith.addi %25, %c1_i32_17 : i32
    %c0_18 = arith.constant 0 : index
    %27 = arith.index_cast %26 : i32 to index
    %c0_19 = arith.constant 0 : index
    %28 = vector.load %arg2[%c0_18, %27, %c0_19] : memref<1x328x4xf32, #tpu.memory_space<vmem>>, vector<1x144x4xf32>
    %29 = vector.shape_cast %28 : vector<1x144x4xf32> to vector<144x4xf32>
    %c0_20 = arith.constant 0 : index
    %c16 = arith.constant 16 : index
    %30 = vector.load %arg7[%c0_20, %c16] : memref<144x36xf32, #tpu.memory_space<vmem>>, vector<144x4xf32>
    tpu.vector_store %arg7[%c0_20, %c16], %29 {strides = array<i32>} : memref<144x36xf32, #tpu.memory_space<vmem>>, vector<144x4xf32>,
    %c18_i32_21 = arith.constant 18 : i32
    %31 = arith.addi %0, %c18_i32_21 : i32
    %c2_i32_22 = arith.constant 2 : i32
    %32 = arith.addi %31, %c2_i32_22 : i32
    %c0_23 = arith.constant 0 : index
    %33 = arith.index_cast %32 : i32 to index
    %c0_24 = arith.constant 0 : index
    %34 = vector.load %arg2[%c0_23, %33, %c0_24] : memref<1x328x4xf32, #tpu.memory_space<vmem>>, vector<1x144x4xf32>
    %35 = vector.shape_cast %34 : vector<1x144x4xf32> to vector<144x4xf32>
    %c0_25 = arith.constant 0 : index
    %c20 = arith.constant 20 : index
    %36 = vector.load %arg7[%c0_25, %c20] : memref<144x36xf32, #tpu.memory_space<vmem>>, vector<144x4xf32>
    tpu.vector_store %arg7[%c0_25, %c20], %35 {strides = array<i32>} : memref<144x36xf32, #tpu.memory_space<vmem>>, vector<144x4xf32>,
    %c36_i32 = arith.constant 36 : i32
    %37 = arith.addi %0, %c36_i32 : i32
    %c0_i32_26 = arith.constant 0 : i32
    %38 = arith.addi %37, %c0_i32_26 : i32
    %c0_27 = arith.constant 0 : index
    %39 = arith.index_cast %38 : i32 to index
    %c0_28 = arith.constant 0 : index
    %40 = vector.load %arg2[%c0_27, %39, %c0_28] : memref<1x328x4xf32, #tpu.memory_space<vmem>>, vector<1x144x4xf32>
    %41 = vector.shape_cast %40 : vector<1x144x4xf32> to vector<144x4xf32>
    %c0_29 = arith.constant 0 : index
    %c24 = arith.constant 24 : index
    %42 = vector.load %arg7[%c0_29, %c24] : memref<144x36xf32, #tpu.memory_space<vmem>>, vector<144x4xf32>
    tpu.vector_store %arg7[%c0_29, %c24], %41 {strides = array<i32>} : memref<144x36xf32, #tpu.memory_space<vmem>>, vector<144x4xf32>,
    %c36_i32_30 = arith.constant 36 : i32
    %43 = arith.addi %0, %c36_i32_30 : i32
    %c1_i32_31 = arith.constant 1 : i32
    %44 = arith.addi %43, %c1_i32_31 : i32
    %c0_32 = arith.constant 0 : index
    %45 = arith.index_cast %44 : i32 to index
    %c0_33 = arith.constant 0 : index
    %46 = vector.load %arg2[%c0_32, %45, %c0_33] : memref<1x328x4xf32, #tpu.memory_space<vmem>>, vector<1x144x4xf32>
    %47 = vector.shape_cast %46 : vector<1x144x4xf32> to vector<144x4xf32>
    %c0_34 = arith.constant 0 : index
    %c28 = arith.constant 28 : index
    %48 = vector.load %arg7[%c0_34, %c28] : memref<144x36xf32, #tpu.memory_space<vmem>>, vector<144x4xf32>
    tpu.vector_store %arg7[%c0_34, %c28], %47 {strides = array<i32>} : memref<144x36xf32, #tpu.memory_space<vmem>>, vector<144x4xf32>,
    %c36_i32_35 = arith.constant 36 : i32
    %49 = arith.addi %0, %c36_i32_35 : i32
    %c2_i32_36 = arith.constant 2 : i32
    %50 = arith.addi %49, %c2_i32_36 : i32
    %c0_37 = arith.constant 0 : index
    %51 = arith.index_cast %50 : i32 to index
    %c0_38 = arith.constant 0 : index
    %52 = vector.load %arg2[%c0_37, %51, %c0_38] : memref<1x328x4xf32, #tpu.memory_space<vmem>>, vector<1x144x4xf32>
    %53 = vector.shape_cast %52 : vector<1x144x4xf32> to vector<144x4xf32>
    %c0_39 = arith.constant 0 : index
    %c32 = arith.constant 32 : index
    %54 = vector.load %arg7[%c0_39, %c32] : memref<144x36xf32, #tpu.memory_space<vmem>>, vector<144x4xf32>
    tpu.vector_store %arg7[%c0_39, %c32], %53 {strides = array<i32>} : memref<144x36xf32, #tpu.memory_space<vmem>>, vector<144x4xf32>,
    %c0_40 = arith.constant 0 : index
    %c0_41 = arith.constant 0 : index
    %55 = vector.load %arg7[%c0_40, %c0_41] : memref<144x36xf32, #tpu.memory_space<vmem>>, vector<144x36xf32>
    %c0_42 = arith.constant 0 : index
    %c0_43 = arith.constant 0 : index
    %56 = vector.load %arg3[%c0_42, %c0_43] : memref<36x128xf32, #tpu.memory_space<vmem>>, vector<36x128xf32>
    %cst = arith.constant dense<0.000000e+00> : vector<144x128xf32>
    %57 = tpu.matmul %55, %56, %cst {dimension_numbers = #tpu.dot_dimension_numbers<[1], [0], [0], [1], [0, 0, 1, 1], [], []>} : vector<144x36xf32>, vector<36x128xf32>, vector<144x128xf32> -> vector<144x128xf32>
    %c0_44 = arith.constant 0 : index
    %c0_45 = arith.constant 0 : index
    %58 = vector.load %arg4[%c0_44, %c0_45] : memref<1x128xf32, #tpu.memory_space<vmem>>, vector<1x128xf32>
    %59 = vector.broadcast %58 : vector<1x128xf32> to vector<144x128xf32>
    %60 = arith.mulf %57, %59 : vector<144x128xf32>
    %c0_46 = arith.constant 0 : index
    %c0_47 = arith.constant 0 : index
    %61 = vector.load %arg5[%c0_46, %c0_47] : memref<1x128xf32, #tpu.memory_space<vmem>>, vector<1x128xf32>
    %62 = vector.broadcast %61 : vector<1x128xf32> to vector<144x128xf32>
    %63 = arith.addf %60, %62 : vector<144x128xf32>
    %cst_48 = arith.constant 0.000000e+00 : f32
    %64 = vector.broadcast %cst_48 : f32 to vector<144x128xf32>
    %65 = arith.maximumf %63, %64 : vector<144x128xf32>
    %c0_49 = arith.constant 0 : index
    %c0_50 = arith.constant 0 : index
    %c0_51 = arith.constant 0 : index
    %66 = vector.load %arg6[%c0_49, %c0_50, %c0_51] : memref<1x144x128xf32, #tpu.memory_space<vmem>>, vector<1x144x128xf32>
    %67 = vector.shape_cast %66 : vector<1x144x128xf32> to vector<144x128xf32>
    %68 = vector.shape_cast %65 : vector<144x128xf32> to vector<1x144x128xf32>
    tpu.vector_store %arg6[%c0_49, %c0_50, %c0_51], %68 {strides = array<i32>} : memref<1x144x128xf32, #tpu.memory_space<vmem>>, vector<1x144x128xf32>,
    return
  }
  func.func @transform_0(%arg0: i32, %arg1: i32) -> (i32, i32, i32) {
    %c0_i32 = arith.constant 0 : i32
    %c0_i32_0 = arith.constant 0 : i32
    %c0_i32_1 = arith.constant 0 : i32
    return %arg0, %c0_i32, %c0_i32_0 : i32, i32, i32
  }
  func.func @transform_1(%arg0: i32, %arg1: i32) -> (i32, i32) {
    %c0_i32 = arith.constant 0 : i32
    %c0_i32_0 = arith.constant 0 : i32
    %c0_i32_1 = arith.constant 0 : i32
    return %c0_i32, %c0_i32_0 : i32, i32
  }
  func.func @transform_2(%arg0: i32, %arg1: i32) -> (i32, i32) {
    %c0_i32 = arith.constant 0 : i32
    %c0_i32_0 = arith.constant 0 : i32
    %c0_i32_1 = arith.constant 0 : i32
    return %c0_i32, %c0_i32_0 : i32, i32
  }
  func.func @transform_3(%arg0: i32, %arg1: i32) -> (i32, i32) {
    %c0_i32 = arith.constant 0 : i32
    %c0_i32_0 = arith.constant 0 : i32
    %c0_i32_1 = arith.constant 0 : i32
    return %c0_i32, %c0_i32_0 : i32, i32
  }
  func.func @transform_4(%arg0: i32, %arg1: i32) -> (i32, i32, i32) {
    %c0_i32 = arith.constant 0 : i32
    %c0_i32_0 = arith.constant 0 : i32
    return %arg0, %arg1, %c0_i32 : i32, i32, i32
  }
}

</mosaic_0001>

<bundles_post_ra>
// kernel: conv2d_bn_relu.1
= control target key start
LH: loop header
LB: loop body
LE: loop exit
PB: predicated region body
PF: predicated region fallthrough
CT: control target
= control target key end

     0   :  { %s1952_s15 = smov 0   ;;  %s1954_s16 = smov 0   ;;  %s2664_s0 = inlined_call_operand.vmem [shape: f32[2,328,4], index: 0, kind: input, shape index: {}]   ;;  %s2665_s1 = inlined_call_operand.vmem [shape: f32[36,128], index: 1, kind: input, shape index: {}]   ;;  %s2666_s2 = inlined_call_operand.vmem [shape: f32[1,128], index: 2, kind: input, shape index: {}]   ;;  %s2667_s3 = inlined_call_operand.vmem [shape: f32[1,128], index: 3, kind: input, shape index: {}]   ;;  %s2668_s4 = inlined_call_operand.vmem [shape: f32[2,288,128], index: 4, kind: output, shape index: {}]  }
   0x1   :  { %s1956_s17 = smov 0   ;;  %s1958_s18 = smov 0  }
   0x2   :  { %s1960_s19 = smov 0  }
   0x3 LB: > { %s23_s20 = sadd.s32 1, %s1909_s17  ;;  %s26_s21 = sadd.s32 1, %s1913_s18  ;;  %s1917_s19 = sphi %s1960_s19, %s14_s19   ;;  %s1913_s18 = sphi %s1958_s18, %s2672_s18   ;;  %s1909_s17 = sphi %s1956_s17, %s2671_s17   ;;  %s1905_s16 = sphi %s1954_s16, %s2670_s16   ;;  %s1901_s15 = sphi %s1952_s15, %s2669_s15  }
   0x4   : > { %p24_p0 = scmp.ge.s32.totalorder %s23_s20, 2  ;;  %p1585_p1 = scmp.ge.s32.totalorder %s1917_s19, 1 }
   0x5   : > { %p176_p2 = scmp.lt.s32.totalorder %s1917_s19, 5 }
   0x6   : > { %s2674_s20 = smov (%p24_p0, %s23_s20), 0  ;;  %s2676_s21 = smov (!%p24_p0, %s26_s21), %s1913_s18 }
   0x7   : > { %p177_p3 = pnand %p1585_p1, %p176_p2  ;;  %p28_p4 = scmp.ge.s32.totalorder %s2676_s21, 2 }
   0x8   : > { %p206_p5 = scmp.lt.s32.totalorder (!%p177_p3), %s1905_s16, 1  ;;  %s221_s22 = smul.u32 (!%p177_p3), 144, %s1901_s15  ;;  %vm241_vm0 = vcmask (!%p177_p3), 31744   ;;  %v1166_v34 = vld [vmem:[%s2665_s1] sm:$0xff] (!%p177_p3)  ;;  %v1167_v35 = vld [vmem:[%s2665_s1 + $0x8] sm:$0xff] (!%p177_p3)  ;;  %v1168_v39 = vld [vmem:[%s2665_s1 + $0x10] sm:$0xff] (!%p177_p3) }
   0x9   : > { %s2678_s21 = smov (%p28_p4, %s2676_s21), 0  ;;  %180 = sbr.rel (%p177_p3) target bundleno = 650 (0x28a), region = 36 }
   0xa   : > { %s1919_s28 = smov (!%p177_p3), 8   ;;  %s1920_s29 = smov (!%p177_p3), 4   ;;  %v1815_v36 = vpack.c.bf16 (!%p177_p3), %v1167_v35, %v1166_v34  ;;  %v1169_v40 = vld [vmem:[%s2665_s1 + $0x18] sm:$0xff] (!%p177_p3)  ;;  %v1170_v46 = vld [vmem:[%s2665_s1 + $0x20] sm:$0xf] (!%p177_p3)  ;;  %vm1226_vm1 = vcmask (!%p177_p3), 1043456  }
   0xb   : > { %s1921_s30 = smov (!%p177_p3), 12   ;;  %s1922_s5 = smov (!%p177_p3), 16   ;;  %v1819_v41 = vpack.c.bf16 (!%p177_p3), %v1169_v40, %v1168_v39  ;;  %vm352_vm2 = vcmask (!%p177_p3), 64544   ;;  %vm463_vm3 = vcmask (!%p177_p3), 97344   ;;  %vm574_vm4 = vcmask (!%p177_p3), 130144  }
   0xc   : > { %s1923_s6 = smov (!%p177_p3), 20   ;;  %s1924_s7 = smov (!%p177_p3), 24   ;;  %1816 = vmatprep.subr.bf16.mxu0 (!%p177_p3), %v1815_v36  ;;  %1823 = vmatprep.subr.bf16.mxu1 (!%p177_p3), %v1815_v36  ;;  %vm685_vm5 = vcmask (!%p177_p3), 162944   ;;  %vm796_vm6 = vcmask (!%p177_p3), 195744   ;;  %vm907_vm7 = vcmask (!%p177_p3), 228544   ;;  %vm1018_vm8 = vcmask (!%p177_p3), 261344  }
   0xd   : > { %s1925_s8 = smov (!%p177_p3), 28   ;;  %1818 = vmatpush3.bf16.msra.mxu0 (!%p177_p3), %v1815_v36  ;;  %1826 = vmatpush3.bf16.msra.mxu1 (!%p177_p3), %v1815_v36  ;;  %s1926_s24 = smov (!%p177_p3), 32   ;;  %vm1129_vm9 = vcmask (!%p177_p3), 294144   ;;  %vm1171_vm10 = vcmask (!%p177_p3), 293888  }
   0xe   : > { %1820 = vmatprep.subr.bf16.mxu0 (!%p177_p3), %v1819_v41  ;;  %1824 = vmatprep.subr.bf16.mxu1 (!%p177_p3), %v1819_v41 }
  0x10   : > { %s2680_s16 = smov (!%p206_p5, %s1905_s16), 1 }
  0x11   : > { %s1829_s23 = smul.u32 328, %s2680_s16  ;;  %1822 = vmatpush3.bf16.msra.mxu0 %v1819_v41  ;;  %1827 = vmatpush3.bf16.msra.mxu1 %v1819_v41 }
  0x12   : > { %1786 = vmatprep.subr.msk.mxu0 %vm1226_vm1, %v1170_v46  ;;  %1825 = vmatprep.subr.msk.mxu1 %vm1226_vm1, %v1170_v46 }
  0x13   : > { %s210_s26 = scalar_lea.vmem %s2664_s0, %s1829_s23 }
  0x14   : > { %s1991_s27 = scalar_lea.vmem %s210_s26, %s221_s22 }
  0x15   : > { %v1606_v0 = vld [vmem:[%s1991_s27 + $0x2] sm:$0xff]  ;;  %v1607_v2 = vld [vmem:[%s1991_s27 + $0xa] sm:$0xff]  ;;  %v1625_v4 = vld [vmem:[%s1991_s27 + $0x1a] sm:$0xff]  ;;  %1787 = vmatpush3.msk.msra.mxu0 %vm1226_vm1, %v1170_v46  ;;  %1828 = vmatpush3.msk.msra.mxu1 %vm1226_vm1, %v1170_v46 }
  0x16   : > { %v1588_v1 = vld [vmem:[%s1991_s27 + $0x1] sm:$0xff]  ;;  %409 = vrot.lane.b32.xlu1 %v1606_v0, %s1919_s28  ;;  %v1589_v3 = vld [vmem:[%s1991_s27 + $0x9] sm:$0xff]  ;;  %v1624_v5 = vld [vmem:[%s1991_s27 + $0x12] sm:$0xff] }
  0x17   : > { %298 = vrot.lane.b32.xlu0 %v1588_v1, %s1920_s29  ;;  %v1590_v6 = vld [vmem:[%s1991_s27 + $0x11] sm:$0xff]  ;;  %v1643_v8 = vld [vmem:[%s1991_s27 + $0x1b] sm:$0xff]  ;;  %v224_v13 = vld [vmem:[%s1991_s27 + $0x8] sm:$0xff] }
  0x18   : > { %v1642_v7 = vld [vmem:[%s1991_s27 + $0x13] sm:$0xff]  ;;  %v223_v12 = vld [vmem:[%s1991_s27] sm:$0xff]  ;;  %243 = vst.msk [vmem:[#allocation2 + $0x8] sm:$0xff] %vm241_vm0, %v224_v13  ;;  %v2066_v26 = vld [vmem:[%s1991_s27 + $0x2a] sm:$0xff] }
  0x19   : > { %v1598_v9 = vld [vmem:[%s1991_s27 + $0x51] sm:$0xff]  ;;  %v1591_v10 = vld [vmem:[%s1991_s27 + $0x19] sm:$0xff]  ;;  %242 = vst.msk [vmem:[#allocation2] sm:$0xff] %vm241_vm0, %v223_v12  ;;  %v2040_v21 = vld [vmem:[%s1991_s27 + $0x24] sm:$0xff] }
  0x1a   : > { %411 = vrot.lane.b32.xlu1 %v1607_v2, %s1919_s28  ;;  %v1660_v11 = vld [vmem:[%s1991_s27 + $0x14] sm:$0xff]  ;;  %v1661_v19 = vld [vmem:[%s1991_s27 + $0x1c] sm:$0xff]  ;;  %v2056_v24 = vld [vmem:[%s1991_s27 + $0x2c] sm:$0xff] }
  0x1b   : > { %300 = vrot.lane.b32.xlu0 %v1589_v3, %s1920_s29  ;;  %v225_v14 = vld [vmem:[%s1991_s27 + $0x10] sm:$0xff]  ;;  %v1599_v16 = vld [vmem:[%s1991_s27 + $0x59] sm:$0xff]  ;;  %v2046_v22 = vld [vmem:[%s1991_s27 + $0x22] sm:$0xff] }
  0x1c   : > { %v233_v15 = vld [vmem:[%s1991_s27 + $0x50] sm:$0xff]  ;;  %244 = vst.msk [vmem:[#allocation2 + $0x10] sm:$0xff] %vm241_vm0, %v225_v14  ;;  %v226_v17 = vld [vmem:[%s1991_s27 + $0x18] sm:$0xff]  ;;  %v2059_v25 = vld [vmem:[%s1991_s27 + $0x62] sm:$0xff] }
  0x1d   : > { %252 = vst.msk [vmem:[#allocation2 + $0x50] sm:$0xff] %vm241_vm0, %v233_v15  ;;  %245 = vst.msk [vmem:[#allocation2 + $0x18] sm:$0xff] %vm241_vm0, %v226_v17  ;;  %v234_v18 = vld [vmem:[%s1991_s27 + $0x58] sm:$0xff]  ;;  %v1696_v27 = vld [vmem:[%s1991_s27 + $0x25] sm:$0xff] }
  0x1e   : > { %522 = vrot.lane.b32.xlu1 %v1625_v4, %s1921_s30  ;;  %253 = vst.msk [vmem:[#allocation2 + $0x58] sm:$0xff] %vm241_vm0, %v234_v18  ;;  %v2034_v20 = vld [vmem:[%s1991_s27 + $0x52] sm:$0xff]  ;;  %v2049_v23 = vld [vmem:[%s1991_s27 + $0x5a] sm:$0xff]  ;;  %v1644_v29 = vld [vmem:[%s1991_s27 + $0x23] sm:$0xff] }
  0x1f   : > { %520 = vrot.lane.b32.xlu0 %v1624_v5, %s1921_s30  ;;  %v227_v28 = vld [vmem:[%s1991_s27 + $0x20] sm:$0xff]  ;;  %v1635_v30 = vld [vmem:[%s1991_s27 + $0x6a] sm:$0xff]  ;;  %v2138_v53 = vld [vmem:[%s1991_s27 + $0x74] sm:$0xff] }
  0x20   : > { %246 = vst.msk [vmem:[#allocation2 + $0x20] sm:$0xff] %vm241_vm0, %v227_v28  ;;  %v235_v31 = vld [vmem:[%s1991_s27 + $0x60] sm:$0xff]  ;;  %v1697_v32 = vld [vmem:[%s1991_s27 + $0x2d] sm:$0xff]  ;;  %v1706_v59 = vld [vmem:[%s1991_s27 + $0x75] sm:$0xff] }
  0x21   : > { %254 = vst.msk [vmem:[#allocation2 + $0x60] sm:$0xff] %vm241_vm0, %v235_v31  ;;  %v1652_v33 = vld [vmem:[%s1991_s27 + $0x63] sm:$0xff]  ;;  %v1645_v42 = vld [vmem:[%s1991_s27 + $0x2b] sm:$0xff]  ;;  %v2141_v54 = vld [vmem:[%s1991_s27 + $0x34] sm:$0xff] }
  0x22   : > { %302 = vrot.lane.b32.xlu1 %v1590_v6, %s1920_s29  ;;  %v1592_v37 = vld [vmem:[%s1991_s27 + $0x21] sm:$0xff]  ;;  %v1653_v47 = vld [vmem:[%s1991_s27 + $0x6b] sm:$0xff]  ;;  %v1698_v60 = vld [vmem:[%s1991_s27 + $0x35] sm:$0xff] }
  0x23   : > { %631 = vrot.lane.b32.xlu0 %v1642_v7, %s1922_s5  ;;  %v1714_v38 = vld [vmem:[%s1991_s27 + $0x26] sm:$0xff]  ;;  %v1715_v48 = vld [vmem:[%s1991_s27 + $0x2e] sm:$0xff]  ;;  %v2161_v57 = vld [vmem:[%s1991_s27 + $0x7c] sm:$0xff] }
  0x24   : > { %v1600_v43 = vld [vmem:[%s1991_s27 + $0x61] sm:$0xff]  ;;  %v1601_v50 = vld [vmem:[%s1991_s27 + $0x69] sm:$0xff]  ;;  %v2151_v55 = vld [vmem:[%s1991_s27 + $0x72] sm:$0xff] }
  0x25   : > { %v236_v44 = vld [vmem:[%s1991_s27 + $0x68] sm:$0xff]  ;;  %v2154_v56 = vld [vmem:[%s1991_s27 + $0x32] sm:$0xff]  ;;  %v2164_v58 = vld [vmem:[%s1991_s27 + $0x3c] sm:$0xff] }
  0x26   : > { %633 = vrot.lane.b32.xlu1 %v1643_v8, %s1922_s5  ;;  %v228_v45 = vld [vmem:[%s1991_s27 + $0x28] sm:$0xff]  ;;  %255 = vst.msk [vmem:[#allocation2 + $0x68] sm:$0xff] %vm241_vm0, %v236_v44  ;;  %v2175_v61 = vld [vmem:[%s1991_s27 + $0x7a] sm:$0xff]  ;;  %v237_v1 = vld [vmem:[%s1991_s27 + $0x70] sm:$0xff] }
  0x27   : > { %318 = vrot.lane.b32.xlu0 %v1598_v9, %s1920_s29  ;;  %247 = vst.msk [vmem:[#allocation2 + $0x28] sm:$0xff] %vm241_vm0, %v228_v45  ;;  %v2117_v49 = vld [vmem:[%s1991_s27 + $0x64] sm:$0xff]  ;;  %v2131_v52 = vld [vmem:[%s1991_s27 + $0x6c] sm:$0xff]  ;;  %v2178_v62 = vld [vmem:[%s1991_s27 + $0x3a] sm:$0xff] }
  0x28   : > { %v1593_v51 = vld [vmem:[%s1991_s27 + $0x29] sm:$0xff]  ;;  %v1654_v63 = vld [vmem:[%s1991_s27 + $0x73] sm:$0xff]  ;;  %256 = vst.msk [vmem:[#allocation2 + $0x70] sm:$0xff] %vm241_vm0, %v237_v1  ;;  %v1707_v3 = vld [vmem:[%s1991_s27 + $0x7d] sm:$0xff] }
  0x29   : > { %v1646_v0 = vld [vmem:[%s1991_s27 + $0x33] sm:$0xff]  ;;  %v1655_v13 = vld [vmem:[%s1991_s27 + $0x7b] sm:$0xff]  ;;  %v2249_v35 = vld [vmem:[%s1991_s27 + $0x84] sm:$0xff] }
  0x2a   : > { %304 = vrot.lane.b32.xlu1 %v1591_v10, %s1920_s29  ;;  %v229_v2 = vld [vmem:[%s1991_s27 + $0x30] sm:$0xff]  ;;  %v1647_v14 = vld [vmem:[%s1991_s27 + $0x3b] sm:$0xff]  ;;  %v2252_v36 = vld [vmem:[%s1991_s27 + $0x44] sm:$0xff] }
  0x2b   : > { %742 = vrot.lane.b32.xlu0 %v1660_v11, %s1923_s6  ;;  %248 = vst.msk [vmem:[#allocation2 + $0x30] sm:$0xff] %vm241_vm0, %v229_v2  ;;  %v1716_v6 = vld [vmem:[%s1991_s27 + $0x36] sm:$0xff]  ;;  %v2267_v41 = vld [vmem:[%s1991_s27 + $0x82] sm:$0xff]  ;;  %v2279_v45 = vld [vmem:[%s1991_s27 + $0x8c] sm:$0xff] }
  0x2c   : > { %v1602_v9 = vld [vmem:[%s1991_s27 + $0x71] sm:$0xff]  ;;  %v1595_v28 = vld [vmem:[%s1991_s27 + $0x39] sm:$0xff] }
  0x2d   : > { %v1594_v10 = vld [vmem:[%s1991_s27 + $0x31] sm:$0xff] }
  0x2e   : > { %413 = vrot.lane.b32.xlu1 %v1624_v5, %s1919_s28  ;;  %v1724_v5 = vld [vmem:[%s1991_s27 + $0x76] sm:$0xff]  ;;  %v2282_v46 = vld [vmem:[%s1991_s27 + $0x4c] sm:$0xff] }
  0x2f   : > { %320 = vrot.lane.b32.xlu0 %v1599_v16, %s1920_s29  ;;  %v238_v15 = vld [vmem:[%s1991_s27 + $0x78] sm:$0xff]  ;;  %v1709_v1 = vld [vmem:[%s1991_s27 + $0x8d] sm:$0xff] }
  0x30   : > { %v230_v16 = vld [vmem:[%s1991_s27 + $0x38] sm:$0xff]  ;;  %257 = vst.msk [vmem:[#allocation2 + $0x78] sm:$0xff] %vm241_vm0, %v238_v15  ;;  %v1701_v2 = vld [vmem:[%s1991_s27 + $0x4d] sm:$0xff] }
  0x31   : > { %249 = vst.msk [vmem:[#allocation2 + $0x38] sm:$0xff] %vm241_vm0, %v230_v16  ;;  %v1649_v15 = vld [vmem:[%s1991_s27 + $0x4b] sm:$0xff] }
  0x32   : > { %744 = vrot.lane.b32.xlu1 %v1661_v19, %s1923_s6  ;;  %v240_v16 = vld [vmem:[%s1991_s27 + $0x88] sm:$0xff] }
  0x33   : > { %429 = vrot.lane.b32.xlu0 %v2034_v20, %s1919_s28  ;;  %259 = vst.msk [vmem:[#allocation2 + $0x88] sm:$0xff] %vm241_vm0, %v240_v16 }
  0x36   : > { %415 = vrot.lane.b32.xlu1 %v1625_v4, %s1919_s28  ;;  %v1699_v4 = vld [vmem:[%s1991_s27 + $0x3d] sm:$0xff] }
  0x37   : > { %853 = vrot.lane.b32.xlu0 %v2040_v21, %s1924_s7 }
  0x3a   : > { %524 = vrot.lane.b32.xlu1 %v2046_v22, %s1921_s30 }
  0x3b   : > { %431 = vrot.lane.b32.xlu0 %v2049_v23, %s1919_s28 }
  0x3e   : > { %855 = vrot.lane.b32.xlu1 %v2056_v24, %s1924_s7 }
  0x3f   : > { %540 = vrot.lane.b32.xlu0 %v2059_v25, %s1921_s30 }
  0x42   : > { %526 = vrot.lane.b32.xlu1 %v2066_v26, %s1921_s30 }
  0x43   : > { %964 = vrot.lane.b32.xlu0 %v1696_v27, %s1925_s8  ;;  %v1603_v27 = vld [vmem:[%s1991_s27 + $0x79] sm:$0xff] }
  0x46   : > { %635 = vrot.lane.b32.xlu1 %v1644_v29, %s1922_s5 }
  0x47   : > { %542 = vrot.lane.b32.xlu0 %v1635_v30, %s1921_s30 }
  0x4a   : > { %966 = vrot.lane.b32.xlu1 %v1697_v32, %s1925_s8 }
  0x4b   : > { %651 = vrot.lane.b32.xlu0 %v1652_v33, %s1922_s5 }
  0x4e   : > { %306 = vrot.lane.b32.xlu1 %v1592_v37, %s1920_s29 }
  0x4f   : > { %1075 = vrot.lane.b32.xlu0 %v1714_v38, %s1926_s24 }
  0x52   : > { %637 = vrot.lane.b32.xlu1 %v1645_v42, %s1922_s5  ;;  %v2270_v42 = vld [vmem:[%s1991_s27 + $0x42] sm:$0xff] }
  0x53   : > { %322 = vrot.lane.b32.xlu0 %v1600_v43, %s1920_s29 }
  0x56   : > { %746 = vrot.lane.b32.xlu1 %v2040_v21, %s1923_s6 }
  0x57   : > { %653 = vrot.lane.b32.xlu0 %v1653_v47, %s1922_s5 }
  0x5a   : > { %1077 = vrot.lane.b32.xlu1 %v1715_v48, %s1926_s24 }
  0x5b   : > { %762 = vrot.lane.b32.xlu0 %v2117_v49, %s1923_s6 }
  0x5e   : > { %324 = vrot.lane.b32.xlu1 %v1601_v50, %s1920_s29  ;;  %v1708_v50 = vld [vmem:[%s1991_s27 + $0x85] sm:$0xff] }
  0x5f   : > { %308 = vrot.lane.b32.xlu0 %v1593_v51, %s1920_s29  ;;  %v1700_v51 = vld [vmem:[%s1991_s27 + $0x45] sm:$0xff] }
  0x62   : > { %433 = vrot.lane.b32.xlu1 %v2059_v25, %s1919_s28 }
  0x63   : > { %417 = vrot.lane.b32.xlu0 %v2046_v22, %s1919_s28  ;;  %v1725_v22 = vld [vmem:[%s1991_s27 + $0x7e] sm:$0xff] }
  0x66   : > { %764 = vrot.lane.b32.xlu1 %v2131_v52, %s1923_s6 }
  0x67   : > { %748 = vrot.lane.b32.xlu0 %v2056_v24, %s1923_s6  ;;  %v1717_v24 = vld [vmem:[%s1991_s27 + $0x3e] sm:$0xff] }
  0x6a   : > { %873 = vrot.lane.b32.xlu1 %v2138_v53, %s1924_s7 }
  0x6b   : > { %857 = vrot.lane.b32.xlu0 %v2141_v54, %s1924_s7 }
  0x6e   : > { %435 = vrot.lane.b32.xlu1 %v1635_v30, %s1919_s28 }
  0x6f   : > { %419 = vrot.lane.b32.xlu0 %v2066_v26, %s1919_s28 }
  0x72   : > { %544 = vrot.lane.b32.xlu1 %v2151_v55, %s1921_s30 }
  0x73   : > { %528 = vrot.lane.b32.xlu0 %v2154_v56, %s1921_s30 }
  0x76   : > { %875 = vrot.lane.b32.xlu1 %v2161_v57, %s1924_s7 }
  0x77   : > { %859 = vrot.lane.b32.xlu0 %v2164_v58, %s1924_s7 }
  0x7a   : > { %984 = vrot.lane.b32.xlu1 %v1706_v59, %s1925_s8  ;;  %v1656_v59 = vld [vmem:[%s1991_s27 + $0x83] sm:$0xff] }
  0x7b   : > { %968 = vrot.lane.b32.xlu0 %v1698_v60, %s1925_s8  ;;  %v1648_v60 = vld [vmem:[%s1991_s27 + $0x43] sm:$0xff] }
  0x7e   : > { %546 = vrot.lane.b32.xlu1 %v2175_v61, %s1921_s30 }
  0x7f   : > { %530 = vrot.lane.b32.xlu0 %v2178_v62, %s1921_s30 }
  0x82   : > { %655 = vrot.lane.b32.xlu1 %v1654_v63, %s1922_s5 }
  0x83   : > { %639 = vrot.lane.b32.xlu0 %v1646_v0, %s1922_s5 }
  0x86   : > { %986 = vrot.lane.b32.xlu1 %v1707_v3, %s1925_s8 }
  0x87   : > { %970 = vrot.lane.b32.xlu0 %v1699_v4, %s1925_s8 }
  0x88   : > { %v410_v7 = vpop.permute.xlu1 %409 }
  0x89   : > { %v299_v8 = vpop.permute.xlu0 %298 }
  0x8a   : > { %353 = vst.msk [vmem:[#allocation2] sm:$0xff] %vm352_vm2, %v299_v8  ;;  %1095 = vrot.lane.b32.xlu1 %v1724_v5, %s1926_s24  ;;  %v1726_v5 = vld [vmem:[%s1991_s27 + $0x86] sm:$0xff] }
  0x8b   : > { %1079 = vrot.lane.b32.xlu0 %v1716_v6, %s1926_s24  ;;  %464 = vst.msk [vmem:[#allocation2] sm:$0xff] %vm463_vm3, %v410_v7  ;;  %v1718_v6 = vld [vmem:[%s1991_s27 + $0x46] sm:$0xff] }
  0x8c   : > { %v412_v11 = vpop.permute.xlu1 %411 }
  0x8d   : > { %v301_v12 = vpop.permute.xlu0 %300 }
  0x8e   : > { %354 = vst.msk [vmem:[#allocation2 + $0x8] sm:$0xff] %vm352_vm2, %v301_v12  ;;  %326 = vrot.lane.b32.xlu1 %v1602_v9, %s1920_s29 }
  0x8f   : > { %310 = vrot.lane.b32.xlu0 %v1594_v10, %s1920_s29  ;;  %465 = vst.msk [vmem:[#allocation2 + $0x8] sm:$0xff] %vm463_vm3, %v412_v11  ;;  %v1604_v10 = vld [vmem:[%s1991_s27 + $0x81] sm:$0xff] }
  0x90   : > { %v523_v17 = vpop.permute.xlu1 %522  ;;  %v1596_v11 = vld [vmem:[%s1991_s27 + $0x41] sm:$0xff] }
  0x91   : > { %v521_v18 = vpop.permute.xlu0 %520  ;;  %576 = vst.msk [vmem:[#allocation2 + $0x8] sm:$0xff] %vm574_vm4, %v523_v17  ;;  %v232_v17 = vld [vmem:[%s1991_s27 + $0x48] sm:$0xff] }
  0x92   : > { %575 = vst.msk [vmem:[#allocation2] sm:$0xff] %vm574_vm4, %v521_v18  ;;  %657 = vrot.lane.b32.xlu1 %v1655_v13, %s1922_s5 }
  0x93   : > { %641 = vrot.lane.b32.xlu0 %v1647_v14, %s1922_s5  ;;  %v1657_v14 = vld [vmem:[%s1991_s27 + $0x8b] sm:$0xff]  ;;  %251 = vst.msk [vmem:[#allocation2 + $0x48] sm:$0xff] %vm241_vm0, %v232_v17 }
  0x94   : > { %v303_v19 = vpop.permute.xlu1 %302 }
  0x95   : > { %v632_v21 = vpop.permute.xlu0 %631  ;;  %355 = vst.msk [vmem:[#allocation2 + $0x10] sm:$0xff] %vm352_vm2, %v303_v19 }
  0x96   : > { %686 = vst.msk [vmem:[#allocation2] sm:$0xff] %vm685_vm5, %v632_v21  ;;  %766 = vrot.lane.b32.xlu1 %v2138_v53, %s1923_s6 }
  0x97   : > { %750 = vrot.lane.b32.xlu0 %v2141_v54, %s1923_s6 }
  0x98   : > { %v634_v25 = vpop.permute.xlu1 %633 }
  0x99   : > { %v319_v26 = vpop.permute.xlu0 %318  ;;  %687 = vst.msk [vmem:[#allocation2 + $0x8] sm:$0xff] %vm685_vm5, %v634_v25  ;;  %v1727_v25 = vld [vmem:[%s1991_s27 + $0x8e] sm:$0xff] }
  0x9a   : > { %363 = vst.msk [vmem:[#allocation2 + $0x50] sm:$0xff] %vm352_vm2, %v319_v26  ;;  %1097 = vrot.lane.b32.xlu1 %v1725_v22, %s1926_s24  ;;  %v1719_v26 = vld [vmem:[%s1991_s27 + $0x4e] sm:$0xff] }
  0x9b   : > { %1081 = vrot.lane.b32.xlu0 %v1717_v24, %s1926_s24 }
  0x9c   : > { %v305_v29 = vpop.permute.xlu1 %304 }
  0x9d   : > { %v743_v30 = vpop.permute.xlu0 %742  ;;  %356 = vst.msk [vmem:[#allocation2 + $0x18] sm:$0xff] %vm352_vm2, %v305_v29  ;;  %v1605_v29 = vld [vmem:[%s1991_s27 + $0x89] sm:$0xff] }
  0x9e   : > { %797 = vst.msk [vmem:[#allocation2] sm:$0xff] %vm796_vm6, %v743_v30  ;;  %328 = vrot.lane.b32.xlu1 %v1603_v27, %s1920_s29  ;;  %v1597_v30 = vld [vmem:[%s1991_s27 + $0x49] sm:$0xff] }
  0x9f   : > { %312 = vrot.lane.b32.xlu0 %v1595_v28, %s1920_s29 }
  0xa0   : > { %v414_v31 = vpop.permute.xlu1 %413 }
  0xa1   : > { %v321_v32 = vpop.permute.xlu0 %320  ;;  %466 = vst.msk [vmem:[#allocation2 + $0x10] sm:$0xff] %vm463_vm3, %v414_v31 }
  0xa2   : > { %364 = vst.msk [vmem:[#allocation2 + $0x58] sm:$0xff] %vm352_vm2, %v321_v32  ;;  %437 = vrot.lane.b32.xlu1 %v2151_v55, %s1919_s28  ;;  %v2297_v55 = vld [vmem:[%s1991_s27 + $0x8a] sm:$0xff] }
  0xa3   : > { %421 = vrot.lane.b32.xlu0 %v2154_v56, %s1919_s28  ;;  %v2300_v56 = vld [vmem:[%s1991_s27 + $0x4a] sm:$0xff] }
  0xa4   : > { %v745_v33 = vpop.permute.xlu1 %744 }
  0xa5   : > { %v430_v34 = vpop.permute.xlu0 %429  ;;  %798 = vst.msk [vmem:[#allocation2 + $0x8] sm:$0xff] %vm796_vm6, %v745_v33 }
  0xa6   : > { %474 = vst.msk [vmem:[#allocation2 + $0x50] sm:$0xff] %vm463_vm3, %v430_v34  ;;  %768 = vrot.lane.b32.xlu1 %v2161_v57, %s1923_s6 }
  0xa7   : > { %752 = vrot.lane.b32.xlu0 %v2164_v58, %s1923_s6 }
  0xa8   : > { %v416_v37 = vpop.permute.xlu1 %415 }
  0xa9   : > { %v854_v38 = vpop.permute.xlu0 %853  ;;  %467 = vst.msk [vmem:[#allocation2 + $0x18] sm:$0xff] %vm463_vm3, %v416_v37  ;;  %v2379_v37 = vld [vmem:[%s1991_s27 + $0x94] sm:$0xff] }
  0xaa   : > { %908 = vst.msk [vmem:[#allocation2] sm:$0xff] %vm907_vm7, %v854_v38  ;;  %877 = vrot.lane.b32.xlu1 %v2249_v35, %s1924_s7  ;;  %v2382_v38 = vld [vmem:[%s1991_s27 + $0x54] sm:$0xff] }
  0xab   : > { %861 = vrot.lane.b32.xlu0 %v2252_v36, %s1924_s7 }
  0xac   : > { %v525_v39 = vpop.permute.xlu1 %524 }
  0xad   : > { %v432_v40 = vpop.permute.xlu0 %431  ;;  %577 = vst.msk [vmem:[#allocation2 + $0x10] sm:$0xff] %vm574_vm4, %v525_v39 }
  0xae   : > { %475 = vst.msk [vmem:[#allocation2 + $0x58] sm:$0xff] %vm463_vm3, %v432_v40  ;;  %439 = vrot.lane.b32.xlu1 %v2175_v61, %s1919_s28  ;;  %v239_v61 = vld [vmem:[%s1991_s27 + $0x80] sm:$0xff] }
  0xaf   : > { %423 = vrot.lane.b32.xlu0 %v2178_v62, %s1919_s28  ;;  %v231_v62 = vld [vmem:[%s1991_s27 + $0x40] sm:$0xff]  ;;  %258 = vst.msk [vmem:[#allocation2 + $0x80] sm:$0xff] %vm241_vm0, %v239_v61 }
  0xb0   : > { %v856_v43 = vpop.permute.xlu1 %855  ;;  %250 = vst.msk [vmem:[#allocation2 + $0x40] sm:$0xff] %vm241_vm0, %v231_v62  ;;  %v1711_v62 = vld [vmem:[%s1991_s27 + $0x9d] sm:$0xff] }
  0xb1   : > { %v541_v44 = vpop.permute.xlu0 %540  ;;  %909 = vst.msk [vmem:[#allocation2 + $0x8] sm:$0xff] %vm907_vm7, %v856_v43  ;;  %v1640_v43 = vld [vmem:[%s1991_s27 + $0x92] sm:$0xff] }
  0xb2   : > { %585 = vst.msk [vmem:[#allocation2 + $0x50] sm:$0xff] %vm574_vm4, %v541_v44  ;;  %548 = vrot.lane.b32.xlu1 %v2267_v41, %s1921_s30 }
  0xb3   : > { %532 = vrot.lane.b32.xlu0 %v2270_v42, %s1921_s30 }
  0xb4   : > { %v527_v47 = vpop.permute.xlu1 %526 }
  0xb5   : > { %v965_v48 = vpop.permute.xlu0 %964  ;;  %578 = vst.msk [vmem:[#allocation2 + $0x18] sm:$0xff] %vm574_vm4, %v527_v47  ;;  %v2406_v47 = vld [vmem:[%s1991_s27 + $0x5c] sm:$0xff] }
  0xb6   : > { %1019 = vst.msk [vmem:[#allocation2] sm:$0xff] %vm1018_vm8, %v965_v48  ;;  %879 = vrot.lane.b32.xlu1 %v2279_v45, %s1924_s7 }
  0xb7   : > { %863 = vrot.lane.b32.xlu0 %v2282_v46, %s1924_s7 }
  0xb8   : > { %v636_v53 = vpop.permute.xlu1 %635 }
  0xb9   : > { %v543_v54 = vpop.permute.xlu0 %542  ;;  %688 = vst.msk [vmem:[#allocation2 + $0x10] sm:$0xff] %vm685_vm5, %v636_v53 }
  0xba   : > { %586 = vst.msk [vmem:[#allocation2 + $0x58] sm:$0xff] %vm574_vm4, %v543_v54  ;;  %988 = vrot.lane.b32.xlu1 %v1708_v50, %s1925_s8 }
  0xbb   : > { %972 = vrot.lane.b32.xlu0 %v1700_v51, %s1925_s8  ;;  %v1710_v51 = vld [vmem:[%s1991_s27 + $0x95] sm:$0xff] }
  0xbc   : > { %v967_v57 = vpop.permute.xlu1 %966 }
  0xbd   : > { %v652_v58 = vpop.permute.xlu0 %651  ;;  %1020 = vst.msk [vmem:[#allocation2 + $0x8] sm:$0xff] %vm1018_vm8, %v967_v57 }
  0xbe   : > { %696 = vst.msk [vmem:[#allocation2 + $0x50] sm:$0xff] %vm685_vm5, %v652_v58  ;;  %550 = vrot.lane.b32.xlu1 %v2297_v55, %s1921_s30  ;;  %v1658_v58 = vld [vmem:[%s1991_s27 + $0x93] sm:$0xff] }
  0xbf   : > { %534 = vrot.lane.b32.xlu0 %v2300_v56, %s1921_s30 }
  0xc0   : > { %v307_v63 = vpop.permute.xlu1 %306 }
  0xc1   : > { %v1076_v0 = vpop.permute.xlu0 %1075  ;;  %357 = vst.msk [vmem:[#allocation2 + $0x20] sm:$0xff] %vm352_vm2, %v307_v63  ;;  %v1703_v63 = vld [vmem:[%s1991_s27 + $0x5d] sm:$0xff] }
  0xc2   : > { %1130 = vst.msk [vmem:[#allocation2] sm:$0xff] %vm1129_vm9, %v1076_v0  ;;  %659 = vrot.lane.b32.xlu1 %v1656_v59, %s1922_s5  ;;  %v1650_v59 = vld [vmem:[%s1991_s27 + $0x53] sm:$0xff] }
  0xc3   : > { %643 = vrot.lane.b32.xlu0 %v1648_v60, %s1922_s5 }
  0xc4   : > { %v638_v3 = vpop.permute.xlu1 %637 }
  0xc5   : > { %v323_v4 = vpop.permute.xlu0 %322  ;;  %689 = vst.msk [vmem:[#allocation2 + $0x18] sm:$0xff] %vm685_vm5, %v638_v3  ;;  %v1728_v3 = vld [vmem:[%s1991_s27 + $0x96] sm:$0xff] }
  0xc6   : > { %365 = vst.msk [vmem:[#allocation2 + $0x60] sm:$0xff] %vm352_vm2, %v323_v4  ;;  %990 = vrot.lane.b32.xlu1 %v1709_v1, %s1925_s8  ;;  %v1720_v4 = vld [vmem:[%s1991_s27 + $0x56] sm:$0xff] }
  0xc7   : > { %974 = vrot.lane.b32.xlu0 %v1701_v2, %s1925_s8 }
  0xc8   : > { %v747_v7 = vpop.permute.xlu1 %746 }
  0xc9   : > { %v654_v8 = vpop.permute.xlu0 %653  ;;  %v1148_v9 = vld [vmem:[#allocation2] sm:$0xff]  ;;  %799 = vst.msk [vmem:[#allocation2 + $0x10] sm:$0xff] %vm796_vm6, %v747_v7 }
  0xca   : > { %697 = vst.msk [vmem:[#allocation2 + $0x58] sm:$0xff] %vm685_vm5, %v654_v8  ;;  %1788 = vmatprep.mubr.msk.f32.mxu0 %vm1171_vm10, %v1148_v9  ;;  %1099 = vrot.lane.b32.xlu1 %v1726_v5, %s1926_s24  ;;  %v1659_v7 = vld [vmem:[%s1991_s27 + $0x9b] sm:$0xff] }
  0xcb   : > { %1083 = vrot.lane.b32.xlu0 %v1718_v6, %s1926_s24  ;;  %v1651_v8 = vld [vmem:[%s1991_s27 + $0x5b] sm:$0xff] }
  0xcc   : > { %v1078_v12 = vpop.permute.xlu1 %1077 }
  0xcd   : > { %v763_v13 = vpop.permute.xlu0 %762  ;;  %1131 = vst.msk [vmem:[#allocation2 + $0x8] sm:$0xff] %vm1129_vm9, %v1078_v12 }
  0xce   : > { %807 = vst.msk [vmem:[#allocation2 + $0x50] sm:$0xff] %vm796_vm6, %v763_v13  ;;  %330 = vrot.lane.b32.xlu1 %v1604_v10, %s1920_s29  ;;  %v1729_v13 = vld [vmem:[%s1991_s27 + $0x9e] sm:$0xff] }
  0xcf   : > { %314 = vrot.lane.b32.xlu0 %v1596_v11, %s1920_s29 }
  0xd0   : > { %v325_v18 = vpop.permute.xlu1 %324 }
  0xd1   : > { %v309_v19 = vpop.permute.xlu0 %308  ;;  %366 = vst.msk [vmem:[#allocation2 + $0x68] sm:$0xff] %vm352_vm2, %v325_v18 }
  0xd2   : > { %358 = vst.msk [vmem:[#allocation2 + $0x28] sm:$0xff] %vm352_vm2, %v309_v19  ;;  %661 = vrot.lane.b32.xlu1 %v1657_v14, %s1922_s5  ;;  %v1721_v14 = vld [vmem:[%s1991_s27 + $0x5e] sm:$0xff] }
  0xd3   : > { %645 = vrot.lane.b32.xlu0 %v1649_v15, %s1922_s5 }
  0xd4   : > { %v434_v21 = vpop.permute.xlu1 %433  ;;  %v1149_v24 = vld [vmem:[#allocation2 + $0x8] sm:$0xff] }
  0xd5   : > { %v418_v22 = vpop.permute.xlu0 %417  ;;  %476 = vst.msk [vmem:[#allocation2 + $0x60] sm:$0xff] %vm463_vm3, %v434_v21  ;;  %1789 = vmatmul.mubr.msk.f32.vlgmr.msra.gmra.mrb[0].mxu0 %vm1171_vm10, %v1149_v24 }
  0xd6   : > { %468 = vst.msk [vmem:[#allocation2 + $0x20] sm:$0xff] %vm463_vm3, %v418_v22  ;;  %770 = vrot.lane.b32.xlu1 %v2249_v35, %s1923_s6  ;;  %v1694_v22 = vld [vmem:[%s1991_s27 + $0xa4] sm:$0xff] }
  0xd7   : > { %754 = vrot.lane.b32.xlu0 %v2252_v36, %s1923_s6 }
  0xd8   : > { %v765_v27 = vpop.permute.xlu1 %764 }
  0xd9   : > { %v749_v28 = vpop.permute.xlu0 %748  ;;  %808 = vst.msk [vmem:[#allocation2 + $0x58] sm:$0xff] %vm796_vm6, %v765_v27 }
  0xda   : > { %800 = vst.msk [vmem:[#allocation2 + $0x18] sm:$0xff] %vm796_vm6, %v749_v28  ;;  %1101 = vrot.lane.b32.xlu1 %v1727_v25, %s1926_s24 }
  0xdb   : > { %1085 = vrot.lane.b32.xlu0 %v1719_v26, %s1926_s24  ;;  %v1695_v26 = vld [vmem:[%s1991_s27 + $0xac] sm:$0xff] }
  0xdc   : > { %v874_v31 = vpop.permute.xlu1 %873 }
  0xdd   : > { %v858_v32 = vpop.permute.xlu0 %857  ;;  %918 = vst.msk [vmem:[#allocation2 + $0x50] sm:$0xff] %vm907_vm7, %v874_v31 }
  0xde   : > { %910 = vst.msk [vmem:[#allocation2 + $0x10] sm:$0xff] %vm907_vm7, %v858_v32  ;;  %332 = vrot.lane.b32.xlu1 %v1605_v29, %s1920_s29  ;;  %v1712_v29 = vld [vmem:[%s1991_s27 + $0xa5] sm:$0xff]  ;;  %v1713_v32 = vld [vmem:[%s1991_s27 + $0xad] sm:$0xff] }
  0xdf   : > { %316 = vrot.lane.b32.xlu0 %v1597_v30, %s1920_s29  ;;  %v1704_v30 = vld [vmem:[%s1991_s27 + $0x65] sm:$0xff] }
  0xe0   : > { %v436_v33 = vpop.permute.xlu1 %435 }
  0xe1   : > { %v420_v34 = vpop.permute.xlu0 %419  ;;  %477 = vst.msk [vmem:[#allocation2 + $0x68] sm:$0xff] %vm463_vm3, %v436_v33  ;;  %v1705_v33 = vld [vmem:[%s1991_s27 + $0x6d] sm:$0xff] }
  0xe2   : > { %469 = vst.msk [vmem:[#allocation2 + $0x28] sm:$0xff] %vm463_vm3, %v420_v34  ;;  %441 = vrot.lane.b32.xlu1 %v2267_v41, %s1919_s28 }
  0xe3   : > { %425 = vrot.lane.b32.xlu0 %v2270_v42, %s1919_s28 }
  0xe4   : > { %v545_v35 = vpop.permute.xlu1 %544 }
  0xe5   : > { %v529_v36 = vpop.permute.xlu0 %528  ;;  %587 = vst.msk [vmem:[#allocation2 + $0x60] sm:$0xff] %vm574_vm4, %v545_v35  ;;  %v1730_v35 = vld [vmem:[%s1991_s27 + $0xa6] sm:$0xff] }
  0xe6   : > { %579 = vst.msk [vmem:[#allocation2 + $0x20] sm:$0xff] %vm574_vm4, %v529_v36  ;;  %772 = vrot.lane.b32.xlu1 %v2279_v45, %s1923_s6  ;;  %v1722_v36 = vld [vmem:[%s1991_s27 + $0x66] sm:$0xff] }
  0xe7   : > { %756 = vrot.lane.b32.xlu0 %v2282_v46, %s1923_s6  ;;  %v2403_v46 = vld [vmem:[%s1991_s27 + $0x9c] sm:$0xff] }
  0xe8   : > { %v876_v39 = vpop.permute.xlu1 %875 }
  0xe9   : > { %v860_v40 = vpop.permute.xlu0 %859  ;;  %919 = vst.msk [vmem:[#allocation2 + $0x58] sm:$0xff] %vm907_vm7, %v876_v39  ;;  %v1731_v39 = vld [vmem:[%s1991_s27 + $0xae] sm:$0xff] }
  0xea   : > { %911 = vst.msk [vmem:[#allocation2 + $0x18] sm:$0xff] %vm907_vm7, %v860_v40  ;;  %881 = vrot.lane.b32.xlu1 %v2379_v37, %s1924_s7  ;;  %v1723_v40 = vld [vmem:[%s1991_s27 + $0x6e] sm:$0xff] }
  0xeb   : > { %865 = vrot.lane.b32.xlu0 %v2382_v38, %s1924_s7 }
  0xec   : > { %v985_v41 = vpop.permute.xlu1 %984 }
  0xed   : > { %v969_v42 = vpop.permute.xlu0 %968  ;;  %1029 = vst.msk [vmem:[#allocation2 + $0x50] sm:$0xff] %vm1018_vm8, %v985_v41 }
  0xee   : > { %1021 = vst.msk [vmem:[#allocation2 + $0x10] sm:$0xff] %vm1018_vm8, %v969_v42  ;;  %443 = vrot.lane.b32.xlu1 %v2297_v55, %s1919_s28  ;;  %v1641_v55 = vld [vmem:[%s1991_s27 + $0x9a] sm:$0xff] }
  0xef   : > { %427 = vrot.lane.b32.xlu0 %v2300_v56, %s1919_s28  ;;  %s1830_s28 = smul.u32 36, %s2680_s16 }
  0xf0   : > { %v547_v44 = vpop.permute.xlu1 %546 }
  0xf1   : > { %v531_v45 = vpop.permute.xlu0 %530  ;;  %588 = vst.msk [vmem:[#allocation2 + $0x68] sm:$0xff] %vm574_vm4, %v547_v44 }
  0xf2   : > { %580 = vst.msk [vmem:[#allocation2 + $0x28] sm:$0xff] %vm574_vm4, %v531_v45  ;;  %552 = vrot.lane.b32.xlu1 %v1640_v43, %s1921_s30 }
  0xf3   : > { %536 = vrot.lane.b32.xlu0 %v2034_v20, %s1921_s30  ;;  %v1702_v20 = vld [vmem:[%s1991_s27 + $0x55] sm:$0xff]  ;;  %s211_s27 = smul.u32 18, %s1901_s15 }
  0xf4   : > { %v656_v48 = vpop.permute.xlu1 %655 }
  0xf5   : > { %v640_v50 = vpop.permute.xlu0 %639  ;;  %698 = vst.msk [vmem:[#allocation2 + $0x60] sm:$0xff] %vm685_vm5, %v656_v48  ;;  %p214_p6 = scmp.lt.s32.totalorder %s211_s27, 35 }
  0xf6   : > { %690 = vst.msk [vmem:[#allocation2 + $0x20] sm:$0xff] %vm685_vm5, %v640_v50  ;;  %883 = vrot.lane.b32.xlu1 %v2403_v46, %s1924_s7 }
  0xf7   : > { %867 = vrot.lane.b32.xlu0 %v2406_v47, %s1924_s7  ;;  %s2682_s27 = smov (!%p214_p6, %s211_s27), 35 }
  0xf8   : > { %v987_v53 = vpop.permute.xlu1 %986  ;;  %s217_s15 = sadd.s32 %s1830_s28, %s2682_s27 }
  0xf9   : > { %v971_v54 = vpop.permute.xlu0 %970  ;;  %1030 = vst.msk [vmem:[#allocation2 + $0x58] sm:$0xff] %vm1018_vm8, %v987_v53  ;;  %s1587_s16 = sshll.u32 %s217_s15, 3 }
  0xfa   : > { %1022 = vst.msk [vmem:[#allocation2 + $0x18] sm:$0xff] %vm1018_vm8, %v971_v54  ;;  %992 = vrot.lane.b32.xlu1 %v1710_v51, %s1925_s8  ;;  %s2594_s9 = scalar_lea.vmem %s2668_s4, %s1587_s16 }
  0xfb   : > { %976 = vrot.lane.b32.xlu0 %v1702_v20, %s1925_s8 }
  0xfc   : > { %v1096_v56 = vpop.permute.xlu1 %1095 }
  0xfd   : > { %v1080_v57 = vpop.permute.xlu0 %1079  ;;  %1140 = vst.msk [vmem:[#allocation2 + $0x50] sm:$0xff] %vm1129_vm9, %v1096_v56 }
  0xfe   : > { %1132 = vst.msk [vmem:[#allocation2 + $0x10] sm:$0xff] %vm1129_vm9, %v1080_v57  ;;  %554 = vrot.lane.b32.xlu1 %v1641_v55, %s1921_s30 }
  0xff   : > { %538 = vrot.lane.b32.xlu0 %v2049_v23, %s1921_s30 }
 0x100   : > { %v327_v60 = vpop.permute.xlu1 %326 }
 0x101   : > { %v311_v61 = vpop.permute.xlu0 %310  ;;  %367 = vst.msk [vmem:[#allocation2 + $0x70] sm:$0xff] %vm352_vm2, %v327_v60 }
 0x102   : > { %359 = vst.msk [vmem:[#allocation2 + $0x30] sm:$0xff] %vm352_vm2, %v311_v61  ;;  %663 = vrot.lane.b32.xlu1 %v1658_v58, %s1922_s5 }
 0x103   : > { %647 = vrot.lane.b32.xlu0 %v1650_v59, %s1922_s5 }
 0x104   : > { %v658_v0 = vpop.permute.xlu1 %657  ;;  %v1158_v23 = vld [vmem:[#allocation2 + $0x50] sm:$0xff] }
 0x105   : > { %v642_v1 = vpop.permute.xlu0 %641  ;;  %v1150_v2 = vld [vmem:[#allocation2 + $0x10] sm:$0xff]  ;;  %699 = vst.msk [vmem:[#allocation2 + $0x68] sm:$0xff] %vm685_vm5, %v658_v0  ;;  %1803 = vmatprep.mubr.msk.f32.mxu1 %vm1171_vm10, %v1158_v23 }
 0x106   : > { %691 = vst.msk [vmem:[#allocation2 + $0x28] sm:$0xff] %vm685_vm5, %v642_v1  ;;  %1791 = vmatprep.mubr.msk.f32.mxu0 %vm1171_vm10, %v1150_v2  ;;  %994 = vrot.lane.b32.xlu1 %v1711_v62, %s1925_s8 }
 0x107   : > { %978 = vrot.lane.b32.xlu0 %v1703_v63, %s1925_s8 }
 0x108   : > { %v767_v5 = vpop.permute.xlu1 %766 }
 0x109   : > { %v751_v6 = vpop.permute.xlu0 %750  ;;  %809 = vst.msk [vmem:[#allocation2 + $0x60] sm:$0xff] %vm796_vm6, %v767_v5 }
 0x10a   : > { %801 = vst.msk [vmem:[#allocation2 + $0x20] sm:$0xff] %vm796_vm6, %v751_v6  ;;  %1103 = vrot.lane.b32.xlu1 %v1728_v3, %s1926_s24 }
 0x10b   : > { %1087 = vrot.lane.b32.xlu0 %v1720_v4, %s1926_s24 }
 0x10c   : > { %v1098_v9 = vpop.permute.xlu1 %1097 }
 0x10d   : > { %v1082_v10 = vpop.permute.xlu0 %1081  ;;  %1141 = vst.msk [vmem:[#allocation2 + $0x58] sm:$0xff] %vm1129_vm9, %v1098_v9 }
 0x10e   : > { %1133 = vst.msk [vmem:[#allocation2 + $0x18] sm:$0xff] %vm1129_vm9, %v1082_v10  ;;  %665 = vrot.lane.b32.xlu1 %v1659_v7, %s1922_s5 }
 0x10f   : > { %649 = vrot.lane.b32.xlu0 %v1651_v8, %s1922_s5 }
 0x110   : > { %v329_v11 = vpop.permute.xlu1 %328 }
 0x111   : > { %v313_v12 = vpop.permute.xlu0 %312  ;;  %368 = vst.msk [vmem:[#allocation2 + $0x78] sm:$0xff] %vm352_vm2, %v329_v11 }
 0x112   : > { %360 = vst.msk [vmem:[#allocation2 + $0x38] sm:$0xff] %vm352_vm2, %v313_v12  ;;  %774 = vrot.lane.b32.xlu1 %v2379_v37, %s1923_s6 }
 0x113   : > { %758 = vrot.lane.b32.xlu0 %v2382_v38, %s1923_s6 }
 0x114   : > { %v438_v15 = vpop.permute.xlu1 %437  ;;  %v1159_v18 = vld [vmem:[#allocation2 + $0x58] sm:$0xff] }
 0x115   : > { %v422_v16 = vpop.permute.xlu0 %421  ;;  %v1151_v17 = vld [vmem:[#allocation2 + $0x18] sm:$0xff]  ;;  %478 = vst.msk [vmem:[#allocation2 + $0x70] sm:$0xff] %vm463_vm3, %v438_v15  ;;  %1804 = vmatmul.mubr.msk.f32.vlgmr.msra.gmra.mrb[0].mxu1 %vm1171_vm10, %v1159_v18 }
 0x116   : > { %470 = vst.msk [vmem:[#allocation2 + $0x30] sm:$0xff] %vm463_vm3, %v422_v16  ;;  %1792 = vmatmul.mubr.msk.f32.gmra.mrb[2].mxu0 %vm1171_vm10, %v1151_v17  ;;  %1105 = vrot.lane.b32.xlu1 %v1729_v13, %s1926_s24 }
 0x117   : > { %1089 = vrot.lane.b32.xlu0 %v1721_v14, %s1926_s24 }
 0x118   : > { %v769_v19 = vpop.permute.xlu1 %768 }
 0x119   : > { %v753_v21 = vpop.permute.xlu0 %752  ;;  %810 = vst.msk [vmem:[#allocation2 + $0x68] sm:$0xff] %vm796_vm6, %v769_v19 }
 0x11a   : > { %802 = vst.msk [vmem:[#allocation2 + $0x28] sm:$0xff] %vm796_vm6, %v753_v21  ;;  %776 = vrot.lane.b32.xlu1 %v2403_v46, %s1923_s6 }
 0x11b   : > { %760 = vrot.lane.b32.xlu0 %v2406_v47, %s1923_s6 }
 0x11c   : > { %v878_v24 = vpop.permute.xlu1 %877 }
 0x11d   : > { %v862_v25 = vpop.permute.xlu0 %861  ;;  %920 = vst.msk [vmem:[#allocation2 + $0x60] sm:$0xff] %vm907_vm7, %v878_v24 }
 0x11e   : > { %912 = vst.msk [vmem:[#allocation2 + $0x20] sm:$0xff] %vm907_vm7, %v862_v25  ;;  %885 = vrot.lane.b32.xlu1 %v1694_v22, %s1924_s7 }
 0x11f   : > { %869 = vrot.lane.b32.xlu0 %v2117_v49, %s1924_s7 }
 0x120   : > { %v440_v27 = vpop.permute.xlu1 %439 }
 0x121   : > { %v424_v28 = vpop.permute.xlu0 %423  ;;  %479 = vst.msk [vmem:[#allocation2 + $0x78] sm:$0xff] %vm463_vm3, %v440_v27 }
 0x122   : > { %471 = vst.msk [vmem:[#allocation2 + $0x38] sm:$0xff] %vm463_vm3, %v424_v28  ;;  %887 = vrot.lane.b32.xlu1 %v1695_v26, %s1924_s7 }
 0x123   : > { %871 = vrot.lane.b32.xlu0 %v2131_v52, %s1924_s7 }
 0x124   : > { %v549_v31 = vpop.permute.xlu1 %548 }
 0x125   : > { %v533_v49 = vpop.permute.xlu0 %532  ;;  %589 = vst.msk [vmem:[#allocation2 + $0x70] sm:$0xff] %vm574_vm4, %v549_v31 }
 0x126   : > { %581 = vst.msk [vmem:[#allocation2 + $0x30] sm:$0xff] %vm574_vm4, %v533_v49  ;;  %996 = vrot.lane.b32.xlu1 %v1712_v29, %s1925_s8 }
 0x127   : > { %980 = vrot.lane.b32.xlu0 %v1704_v30, %s1925_s8 }
 0x128   : > { %v880_v34 = vpop.permute.xlu1 %879 }
 0x129   : > { %v864_v52 = vpop.permute.xlu0 %863  ;;  %921 = vst.msk [vmem:[#allocation2 + $0x68] sm:$0xff] %vm907_vm7, %v880_v34 }
 0x12a   : > { %913 = vst.msk [vmem:[#allocation2 + $0x28] sm:$0xff] %vm907_vm7, %v864_v52  ;;  %998 = vrot.lane.b32.xlu1 %v1713_v32, %s1925_s8 }
 0x12b   : > { %982 = vrot.lane.b32.xlu0 %v1705_v33, %s1925_s8 }
 0x12c   : > { %v989_v37 = vpop.permute.xlu1 %988 }
 0x12d   : > { %v973_v38 = vpop.permute.xlu0 %972  ;;  %1031 = vst.msk [vmem:[#allocation2 + $0x60] sm:$0xff] %vm1018_vm8, %v989_v37 }
 0x12e   : > { %1023 = vst.msk [vmem:[#allocation2 + $0x20] sm:$0xff] %vm1018_vm8, %v973_v38  ;;  %1107 = vrot.lane.b32.xlu1 %v1730_v35, %s1926_s24 }
 0x12f   : > { %1091 = vrot.lane.b32.xlu0 %v1722_v36, %s1926_s24 }
 0x130   : > { %v551_v41 = vpop.permute.xlu1 %550 }
 0x131   : > { %v535_v42 = vpop.permute.xlu0 %534  ;;  %590 = vst.msk [vmem:[#allocation2 + $0x78] sm:$0xff] %vm574_vm4, %v551_v41 }
 0x132   : > { %582 = vst.msk [vmem:[#allocation2 + $0x38] sm:$0xff] %vm574_vm4, %v535_v42  ;;  %1109 = vrot.lane.b32.xlu1 %v1731_v39, %s1926_s24 }
 0x133   : > { %1093 = vrot.lane.b32.xlu0 %v1723_v40, %s1926_s24 }
 0x134   : > { %v660_v43 = vpop.permute.xlu1 %659 }
 0x135   : > { %v644_v44 = vpop.permute.xlu0 %643  ;;  %700 = vst.msk [vmem:[#allocation2 + $0x70] sm:$0xff] %vm685_vm5, %v660_v43 }
 0x136   : > { %692 = vst.msk [vmem:[#allocation2 + $0x30] sm:$0xff] %vm685_vm5, %v644_v44 }
 0x138   : > { %v991_v45 = vpop.permute.xlu1 %990 }
 0x139   : > { %v975_v46 = vpop.permute.xlu0 %974  ;;  %1032 = vst.msk [vmem:[#allocation2 + $0x68] sm:$0xff] %vm1018_vm8, %v991_v45  ;;  %v2579_v45 = vld [vmem:[%s2666_s2] ss:$0 sm:$0xff] }
 0x13a   : > { %1024 = vst.msk [vmem:[#allocation2 + $0x28] sm:$0xff] %vm1018_vm8, %v975_v46 }
 0x13c   : > { %v1100_v47 = vpop.permute.xlu1 %1099 }
 0x13d   : > { %v1084_v48 = vpop.permute.xlu0 %1083  ;;  %1142 = vst.msk [vmem:[#allocation2 + $0x60] sm:$0xff] %vm1129_vm9, %v1100_v47  ;;  %v2584_v47 = vld [vmem:[%s2667_s3] ss:$0 sm:$0xff] }
 0x13e   : > { %1134 = vst.msk [vmem:[#allocation2 + $0x20] sm:$0xff] %vm1129_vm9, %v1084_v48 }
 0x140   : > { %v331_v50 = vpop.permute.xlu1 %330 }
 0x141   : > { %v315_v51 = vpop.permute.xlu0 %314  ;;  %369 = vst.msk [vmem:[#allocation2 + $0x80] sm:$0xff] %vm352_vm2, %v331_v50 }
 0x142   : > { %361 = vst.msk [vmem:[#allocation2 + $0x40] sm:$0xff] %vm352_vm2, %v315_v51 }
 0x144   : > { %v662_v20 = vpop.permute.xlu1 %661  ;;  %v1160_v55 = vld [vmem:[#allocation2 + $0x60] sm:$0xff] }
 0x145   : > { %v646_v53 = vpop.permute.xlu0 %645  ;;  %v1152_v54 = vld [vmem:[#allocation2 + $0x20] sm:$0xff]  ;;  %701 = vst.msk [vmem:[#allocation2 + $0x78] sm:$0xff] %vm685_vm5, %v662_v20  ;;  %1806 = vmatprep.mubr.msk.f32.mxu1 %vm1171_vm10, %v1160_v55 }
 0x146   : > { %693 = vst.msk [vmem:[#allocation2 + $0x38] sm:$0xff] %vm685_vm5, %v646_v53  ;;  %1794 = vmatprep.mubr.msk.f32.mxu0 %vm1171_vm10, %v1152_v54 }
 0x148   : > { %v771_v56 = vpop.permute.xlu1 %770 }
 0x149   : > { %v755_v57 = vpop.permute.xlu0 %754  ;;  %811 = vst.msk [vmem:[#allocation2 + $0x70] sm:$0xff] %vm796_vm6, %v771_v56 }
 0x14a   : > { %803 = vst.msk [vmem:[#allocation2 + $0x30] sm:$0xff] %vm796_vm6, %v755_v57 }
 0x14c   : > { %v1102_v58 = vpop.permute.xlu1 %1101 }
 0x14d   : > { %v1086_v59 = vpop.permute.xlu0 %1085  ;;  %1143 = vst.msk [vmem:[#allocation2 + $0x68] sm:$0xff] %vm1129_vm9, %v1102_v58 }
 0x14e   : > { %1135 = vst.msk [vmem:[#allocation2 + $0x28] sm:$0xff] %vm1129_vm9, %v1086_v59 }
 0x150   : > { %v333_v60 = vpop.permute.xlu1 %332 }
 0x151   : > { %v317_v61 = vpop.permute.xlu0 %316  ;;  %370 = vst.msk [vmem:[#allocation2 + $0x88] sm:$0xff] %vm352_vm2, %v333_v60 }
 0x152   : > { %362 = vst.msk [vmem:[#allocation2 + $0x48] sm:$0xff] %vm352_vm2, %v317_v61 }
 0x154   : > { %v442_v62 = vpop.permute.xlu1 %441  ;;  %v1161_v1 = vld [vmem:[#allocation2 + $0x68] sm:$0xff] }
 0x155   : > { %v426_v63 = vpop.permute.xlu0 %425  ;;  %v1153_v0 = vld [vmem:[#allocation2 + $0x28] sm:$0xff]  ;;  %480 = vst.msk [vmem:[#allocation2 + $0x80] sm:$0xff] %vm463_vm3, %v442_v62  ;;  %1807 = vmatmul.mubr.msk.f32.gmra.mrb[2].mxu1 %vm1171_vm10, %v1161_v1 }
 0x156   : > { %472 = vst.msk [vmem:[#allocation2 + $0x40] sm:$0xff] %vm463_vm3, %v426_v63  ;;  %1795 = vmatmul.mubr.msk.f32.gmra.mrb[4].mxu0 %vm1171_vm10, %v1153_v0 }
 0x158   : > { %v773_v2 = vpop.permute.xlu1 %772 }
 0x159   : > { %v757_v23 = vpop.permute.xlu0 %756  ;;  %812 = vst.msk [vmem:[#allocation2 + $0x78] sm:$0xff] %vm796_vm6, %v773_v2 }
 0x15a   : > { %804 = vst.msk [vmem:[#allocation2 + $0x38] sm:$0xff] %vm796_vm6, %v757_v23 }
 0x15c   : > { %v882_v3 = vpop.permute.xlu1 %881 }
 0x15d   : > { %v866_v4 = vpop.permute.xlu0 %865  ;;  %922 = vst.msk [vmem:[#allocation2 + $0x70] sm:$0xff] %vm907_vm7, %v882_v3 }
 0x15e   : > { %914 = vst.msk [vmem:[#allocation2 + $0x30] sm:$0xff] %vm907_vm7, %v866_v4 }
 0x160   : > { %v444_v5 = vpop.permute.xlu1 %443 }
 0x161   : > { %v428_v6 = vpop.permute.xlu0 %427  ;;  %481 = vst.msk [vmem:[#allocation2 + $0x88] sm:$0xff] %vm463_vm3, %v444_v5 }
 0x162   : > { %473 = vst.msk [vmem:[#allocation2 + $0x48] sm:$0xff] %vm463_vm3, %v428_v6 }
 0x164   : > { %v553_v7 = vpop.permute.xlu1 %552 }
 0x165   : > { %v537_v8 = vpop.permute.xlu0 %536  ;;  %591 = vst.msk [vmem:[#allocation2 + $0x80] sm:$0xff] %vm574_vm4, %v553_v7 }
 0x166   : > { %583 = vst.msk [vmem:[#allocation2 + $0x40] sm:$0xff] %vm574_vm4, %v537_v8 }
 0x168   : > { %v884_v9 = vpop.permute.xlu1 %883 }
 0x169   : > { %v868_v10 = vpop.permute.xlu0 %867  ;;  %923 = vst.msk [vmem:[#allocation2 + $0x78] sm:$0xff] %vm907_vm7, %v884_v9 }
 0x16a   : > { %915 = vst.msk [vmem:[#allocation2 + $0x38] sm:$0xff] %vm907_vm7, %v868_v10 }
 0x16c   : > { %v993_v11 = vpop.permute.xlu1 %992 }
 0x16d   : > { %v977_v12 = vpop.permute.xlu0 %976  ;;  %1033 = vst.msk [vmem:[#allocation2 + $0x70] sm:$0xff] %vm1018_vm8, %v993_v11 }
 0x16e   : > { %1025 = vst.msk [vmem:[#allocation2 + $0x30] sm:$0xff] %vm1018_vm8, %v977_v12 }
 0x170   : > { %v555_v13 = vpop.permute.xlu1 %554 }
 0x171   : > { %v539_v14 = vpop.permute.xlu0 %538  ;;  %592 = vst.msk [vmem:[#allocation2 + $0x88] sm:$0xff] %vm574_vm4, %v555_v13 }
 0x172   : > { %584 = vst.msk [vmem:[#allocation2 + $0x48] sm:$0xff] %vm574_vm4, %v539_v14 }
 0x174   : > { %v664_v15 = vpop.permute.xlu1 %663 }
 0x175   : > { %v648_v16 = vpop.permute.xlu0 %647  ;;  %702 = vst.msk [vmem:[#allocation2 + $0x80] sm:$0xff] %vm685_vm5, %v664_v15 }
 0x176   : > { %694 = vst.msk [vmem:[#allocation2 + $0x40] sm:$0xff] %vm685_vm5, %v648_v16 }
 0x178   : > { %v995_v17 = vpop.permute.xlu1 %994 }
 0x179   : > { %v979_v18 = vpop.permute.xlu0 %978  ;;  %1034 = vst.msk [vmem:[#allocation2 + $0x78] sm:$0xff] %vm1018_vm8, %v995_v17 }
 0x17a   : > { %1026 = vst.msk [vmem:[#allocation2 + $0x38] sm:$0xff] %vm1018_vm8, %v979_v18 }
 0x17c   : > { %v1104_v19 = vpop.permute.xlu1 %1103 }
 0x17d   : > { %v1088_v21 = vpop.permute.xlu0 %1087  ;;  %1144 = vst.msk [vmem:[#allocation2 + $0x70] sm:$0xff] %vm1129_vm9, %v1104_v19 }
 0x17e   : > { %1136 = vst.msk [vmem:[#allocation2 + $0x30] sm:$0xff] %vm1129_vm9, %v1088_v21 }
 0x180   : > { %v666_v22 = vpop.permute.xlu1 %665 }
 0x181   : > { %v650_v24 = vpop.permute.xlu0 %649  ;;  %703 = vst.msk [vmem:[#allocation2 + $0x88] sm:$0xff] %vm685_vm5, %v666_v22 }
 0x182   : > { %695 = vst.msk [vmem:[#allocation2 + $0x48] sm:$0xff] %vm685_vm5, %v650_v24 }
 0x184   : > { %v775_v25 = vpop.permute.xlu1 %774  ;;  %v1162_v28 = vld [vmem:[#allocation2 + $0x70] sm:$0xff] }
 0x185   : > { %v759_v26 = vpop.permute.xlu0 %758  ;;  %v1154_v27 = vld [vmem:[#allocation2 + $0x30] sm:$0xff]  ;;  %813 = vst.msk [vmem:[#allocation2 + $0x80] sm:$0xff] %vm796_vm6, %v775_v25  ;;  %1809 = vmatprep.mubr.msk.f32.mxu1 %vm1171_vm10, %v1162_v28 }
 0x186   : > { %805 = vst.msk [vmem:[#allocation2 + $0x40] sm:$0xff] %vm796_vm6, %v759_v26  ;;  %1797 = vmatprep.mubr.msk.f32.mxu0 %vm1171_vm10, %v1154_v27 }
 0x188   : > { %v1106_v29 = vpop.permute.xlu1 %1105 }
 0x189   : > { %v1090_v30 = vpop.permute.xlu0 %1089  ;;  %1145 = vst.msk [vmem:[#allocation2 + $0x78] sm:$0xff] %vm1129_vm9, %v1106_v29 }
 0x18a   : > { %1137 = vst.msk [vmem:[#allocation2 + $0x38] sm:$0xff] %vm1129_vm9, %v1090_v30 }
 0x18c   : > { %v777_v31 = vpop.permute.xlu1 %776 }
 0x18d   : > { %v761_v49 = vpop.permute.xlu0 %760  ;;  %814 = vst.msk [vmem:[#allocation2 + $0x88] sm:$0xff] %vm796_vm6, %v777_v31 }
 0x18e   : > { %806 = vst.msk [vmem:[#allocation2 + $0x48] sm:$0xff] %vm796_vm6, %v761_v49 }
 0x190   : > { %v886_v32 = vpop.permute.xlu1 %885  ;;  %v1163_v52 = vld [vmem:[#allocation2 + $0x78] sm:$0xff] }
 0x191   : > { %v870_v33 = vpop.permute.xlu0 %869  ;;  %v1155_v34 = vld [vmem:[#allocation2 + $0x38] sm:$0xff]  ;;  %924 = vst.msk [vmem:[#allocation2 + $0x80] sm:$0xff] %vm907_vm7, %v886_v32  ;;  %1810 = vmatmul.mubr.msk.f32.gmra.mrb[4].mxu1 %vm1171_vm10, %v1163_v52 }
 0x192   : > { %916 = vst.msk [vmem:[#allocation2 + $0x40] sm:$0xff] %vm907_vm7, %v870_v33  ;;  %1798 = vmatmul.mubr.msk.f32.gmra.mrb[6].mxu0 %vm1171_vm10, %v1155_v34 }
 0x194   : > { %v888_v35 = vpop.permute.xlu1 %887 }
 0x195   : > { %v872_v36 = vpop.permute.xlu0 %871  ;;  %925 = vst.msk [vmem:[#allocation2 + $0x88] sm:$0xff] %vm907_vm7, %v888_v35 }
 0x196   : > { %917 = vst.msk [vmem:[#allocation2 + $0x48] sm:$0xff] %vm907_vm7, %v872_v36 }
 0x198   : > { %v997_v37 = vpop.permute.xlu1 %996 }
 0x199   : > { %v981_v38 = vpop.permute.xlu0 %980  ;;  %1035 = vst.msk [vmem:[#allocation2 + $0x80] sm:$0xff] %vm1018_vm8, %v997_v37 }
 0x19a   : > { %1027 = vst.msk [vmem:[#allocation2 + $0x40] sm:$0xff] %vm1018_vm8, %v981_v38 }
 0x19c   : > { %v999_v39 = vpop.permute.xlu1 %998 }
 0x19d   : > { %v983_v40 = vpop.permute.xlu0 %982  ;;  %1036 = vst.msk [vmem:[#allocation2 + $0x88] sm:$0xff] %vm1018_vm8, %v999_v39 }
 0x19e   : > { %1028 = vst.msk [vmem:[#allocation2 + $0x48] sm:$0xff] %vm1018_vm8, %v983_v40 }
 0x1a0   : > { %v1108_v41 = vpop.permute.xlu1 %1107 }
 0x1a1   : > { %v1092_v42 = vpop.permute.xlu0 %1091  ;;  %1146 = vst.msk [vmem:[#allocation2 + $0x80] sm:$0xff] %vm1129_vm9, %v1108_v41 }
 0x1a2   : > { %1138 = vst.msk [vmem:[#allocation2 + $0x40] sm:$0xff] %vm1129_vm9, %v1092_v42 }
 0x1a4   : > { %v1110_v43 = vpop.permute.xlu1 %1109 }
 0x1a5   : > { %v1094_v44 = vpop.permute.xlu0 %1093  ;;  %1147 = vst.msk [vmem:[#allocation2 + $0x88] sm:$0xff] %vm1129_vm9, %v1110_v43 }
 0x1a6   : > { %1139 = vst.msk [vmem:[#allocation2 + $0x48] sm:$0xff] %vm1129_vm9, %v1094_v44 }
 0x1a8   : > { %v1790_v46 = vpop.f32.mrb[0].mxu0  ;;  %v1164_v50 = vld [vmem:[#allocation2 + $0x80] sm:$0xff] }
 0x1a9   : > { %v1156_v48 = vld [vmem:[#allocation2 + $0x40] sm:$0xff]  ;;  %v1393_v51 = vmul.f32 %v1790_v46, %v2579_v45  ;;  %v1296_v20 = vpop.f32.mrb[1].mxu0  ;;  %1812 = vmatprep.mubr.msk.f32.mxu1 %vm1171_vm10, %v1164_v50 }
 0x1aa   : > { %1800 = vmatprep.mubr.msk.f32.mxu0 %vm1171_vm10, %v1156_v48  ;;  %v1392_v53 = vmul.f32 %v2579_v45, %v1296_v20 }
 0x1ab   : > { %v1418_v54 = vadd.f32 %v2584_v47, %v1393_v51 }
 0x1ac   : > { %v1417_v55 = vadd.f32 %v2584_v47, %v1392_v53  ;;  %v1165_v57 = vld [vmem:[#allocation2 + $0x88] sm:$0xff] }
 0x1ad   : > { %v1157_v56 = vld [vmem:[#allocation2 + $0x48] sm:$0xff]  ;;  %v1436_v58 = vmax.f32 %v1418_v54, 0.0  ;;  %1813 = vmatmul.mubr.msk.f32.gmra.mrb[6].mxu1 %vm1171_vm10, %v1165_v57 }
 0x1ae   : > { %1801 = vmatmul.mubr.msk.f32.gmra.mrb[8].mxu0 %vm1171_vm10, %v1157_v56  ;;  %v1435_v59 = vmax.f32 %v1417_v55, 0.0 }
 0x1af   : > { %1454 = vst [vmem:[%s2594_s9 + $0x8] sm:$0xff] %v1436_v58 }
 0x1b0   : > { %1453 = vst [vmem:[%s2594_s9] sm:$0xff] %v1435_v59 }
 0x1e8   : > { %v1805_v61 = vpop.f32.mrb[0].mxu1 }
 0x1e9   : > { %v1793_v60 = vpop.f32.mrb[2].mxu0  ;;  %v1403_v63 = vmul.f32 %v1805_v61, %v2579_v45  ;;  %v1346_v1 = vpop.f32.mrb[1].mxu1 }
 0x1ea   : > { %v1395_v62 = vmul.f32 %v1793_v60, %v2579_v45  ;;  %v1306_v0 = vpop.f32.mrb[3].mxu0  ;;  %v1402_v23 = vmul.f32 %v2579_v45, %v1346_v1 }
 0x1eb   : > { %v1394_v2 = vmul.f32 %v2579_v45, %v1306_v0  ;;  %v1428_v4 = vadd.f32 %v2584_v47, %v1403_v63 }
 0x1ec   : > { %v1420_v3 = vadd.f32 %v2584_v47, %v1395_v62  ;;  %v1427_v6 = vadd.f32 %v2584_v47, %v1402_v23 }
 0x1ed   : > { %v1419_v5 = vadd.f32 %v2584_v47, %v1394_v2  ;;  %v1446_v8 = vmax.f32 %v1428_v4, 0.0 }
 0x1ee   : > { %v1438_v7 = vmax.f32 %v1420_v3, 0.0  ;;  %v1445_v10 = vmax.f32 %v1427_v6, 0.0 }
 0x1ef   : > { %v1437_v9 = vmax.f32 %v1419_v5, 0.0  ;;  %1464 = vst [vmem:[%s2594_s9 + $0x58] sm:$0xff] %v1446_v8 }
 0x1f0   : > { %1456 = vst [vmem:[%s2594_s9 + $0x18] sm:$0xff] %v1438_v7  ;;  %1463 = vst [vmem:[%s2594_s9 + $0x50] sm:$0xff] %v1445_v10 }
 0x1f1   : > { %1455 = vst [vmem:[%s2594_s9 + $0x10] sm:$0xff] %v1437_v9 }
 0x228   : > { %v1808_v12 = vpop.f32.mrb[2].mxu1 }
 0x229   : > { %v1796_v11 = vpop.f32.mrb[4].mxu0  ;;  %v1405_v14 = vmul.f32 %v1808_v12, %v2579_v45  ;;  %v1356_v16 = vpop.f32.mrb[3].mxu1 }
 0x22a   : > { %v1397_v13 = vmul.f32 %v1796_v11, %v2579_v45  ;;  %v1316_v15 = vpop.f32.mrb[5].mxu0  ;;  %v1404_v18 = vmul.f32 %v2579_v45, %v1356_v16 }
 0x22b   : > { %v1396_v17 = vmul.f32 %v2579_v45, %v1316_v15  ;;  %v1430_v21 = vadd.f32 %v2584_v47, %v1405_v14 }
 0x22c   : > { %v1422_v19 = vadd.f32 %v2584_v47, %v1397_v13  ;;  %v1429_v24 = vadd.f32 %v2584_v47, %v1404_v18 }
 0x22d   : > { %v1421_v22 = vadd.f32 %v2584_v47, %v1396_v17  ;;  %v1448_v26 = vmax.f32 %v1430_v21, 0.0 }
 0x22e   : > { %v1440_v25 = vmax.f32 %v1422_v19, 0.0  ;;  %v1447_v28 = vmax.f32 %v1429_v24, 0.0 }
 0x22f   : > { %v1439_v27 = vmax.f32 %v1421_v22, 0.0  ;;  %1466 = vst [vmem:[%s2594_s9 + $0x68] sm:$0xff] %v1448_v26 }
 0x230   : > { %1458 = vst [vmem:[%s2594_s9 + $0x28] sm:$0xff] %v1440_v25  ;;  %1465 = vst [vmem:[%s2594_s9 + $0x60] sm:$0xff] %v1447_v28 }
 0x231   : > { %1457 = vst [vmem:[%s2594_s9 + $0x20] sm:$0xff] %v1439_v27 }
 0x264   : > { %v1811_v30 = vpop.f32.mrb[4].mxu1 }
 0x265   : > { %v1799_v29 = vpop.f32.mrb[6].mxu0  ;;  %v1407_v49 = vmul.f32 %v1811_v30, %v2579_v45  ;;  %v1366_v33 = vpop.f32.mrb[5].mxu1 }
 0x266   : > { %v1399_v31 = vmul.f32 %v1799_v29, %v2579_v45  ;;  %v1326_v32 = vpop.f32.mrb[7].mxu0  ;;  %v1406_v52 = vmul.f32 %v2579_v45, %v1366_v33 }
 0x267   : > { %v1398_v34 = vmul.f32 %v2579_v45, %v1326_v32  ;;  %v1432_v36 = vadd.f32 %v2584_v47, %v1407_v49 }
 0x268   : > { %v1424_v35 = vadd.f32 %v2584_v47, %v1399_v31  ;;  %v1431_v38 = vadd.f32 %v2584_v47, %v1406_v52 }
 0x269   : > { %v1423_v37 = vadd.f32 %v2584_v47, %v1398_v34  ;;  %v1450_v40 = vmax.f32 %v1432_v36, 0.0 }
 0x26a   : > { %v1442_v39 = vmax.f32 %v1424_v35, 0.0  ;;  %v1449_v42 = vmax.f32 %v1431_v38, 0.0 }
 0x26b   : > { %v1441_v41 = vmax.f32 %v1423_v37, 0.0  ;;  %1468 = vst [vmem:[%s2594_s9 + $0x78] sm:$0xff] %v1450_v40 }
 0x26c   : > { %1460 = vst [vmem:[%s2594_s9 + $0x38] sm:$0xff] %v1442_v39  ;;  %1467 = vst [vmem:[%s2594_s9 + $0x70] sm:$0xff] %v1449_v42 }
 0x26d   : > { %1459 = vst [vmem:[%s2594_s9 + $0x30] sm:$0xff] %v1441_v41 }
 0x280   : > { %v1814_v44 = vpop.f32.mrb[6].mxu1 }
 0x281   : > { %v1802_v43 = vpop.f32.mrb[8].mxu0  ;;  %v1409_v48 = vmul.f32 %v1814_v44, %v2579_v45  ;;  %v1376_v51 = vpop.f32.mrb[7].mxu1 }
 0x282   : > { %v1401_v46 = vmul.f32 %v1802_v43, %v2579_v45  ;;  %v1336_v50 = vpop.f32.mrb[9].mxu0  ;;  %v1408_v53 = vmul.f32 %v2579_v45, %v1376_v51 }
 0x283   : > { %v1400_v20 = vmul.f32 %v2579_v45, %v1336_v50  ;;  %v1434_v55 = vadd.f32 %v2584_v47, %v1409_v48 }
 0x284   : > { %v1426_v54 = vadd.f32 %v2584_v47, %v1401_v46  ;;  %v1433_v57 = vadd.f32 %v2584_v47, %v1408_v53 }
 0x285   : > { %v1425_v56 = vadd.f32 %v2584_v47, %v1400_v20  ;;  %v1452_v59 = vmax.f32 %v1434_v55, 0.0 }
 0x286   : > { %v1444_v58 = vmax.f32 %v1426_v54, 0.0  ;;  %v1451_v61 = vmax.f32 %v1433_v57, 0.0 }
 0x287   : > { %v1443_v60 = vmax.f32 %v1425_v56, 0.0  ;;  %1470 = vst [vmem:[%s2594_s9 + $0x88] sm:$0xff] %v1452_v59 }
 0x288   : > { %1462 = vst [vmem:[%s2594_s9 + $0x48] sm:$0xff] %v1444_v58  ;;  %1469 = vst [vmem:[%s2594_s9 + $0x80] sm:$0xff] %v1451_v61 }
 0x289   : > { %1461 = vst [vmem:[%s2594_s9 + $0x40] sm:$0xff] %v1443_v60 }
 0x28a PF: > { %s14_s19 = sadd.s32 1, %s1917_s19   ;;  %s2669_s15 = smov %s1909_s17 }
 0x28b   : > { %p11_p7 = scmp.ge.s32.totalorder %s14_s19, 6   ;;  %s2670_s16 = smov %s1913_s18 }
 0x28c   : > { %s2671_s17 = smov %s2674_s20  ;;  %s2672_s18 = smov %s2678_s21 }
 0x28d   :  { %13 = sbr.rel (!%p11_p7) target bundleno = 3 (0x3), region = 75 }

</bundles_post_ra>
